<compile_context>
chip_gen: v7x
topology: tpu7x:2x2x1
jax: 0.10.0
libtpu: 0.0.40
codegen_flags: <defaults>
</compile_context>

<pallas_src>
import math

import jax
import jax.numpy as jnp
from jax import lax
from jax.experimental import pallas as pl
from jax.experimental.pallas import tpu as pltpu


# ----------------------------------------------------------------------------
# Constants / host-side helpers
# ----------------------------------------------------------------------------

def gaussian_kernel_2d(ksize: int, sigma: float) -> jnp.ndarray:
    ax = jnp.arange(ksize, dtype=jnp.float32) - (ksize - 1) / 2.0
    g = jnp.exp(-(ax ** 2) / (2.0 * sigma ** 2))
    k = jnp.outer(g, g)
    return k / jnp.sum(k)


def conv_matrix(gauss: jnp.ndarray, H: int, W: int, ksize: int) -> jnp.ndarray:
    """(H*W, H*W) matrix K such that x_flat @ K == depthwise 'same' conv (zero pad).

    K[h2*W + w2, h*W + w] = gauss[h2 - h + P, w2 - w + P] when the offset lies
    inside the kernel support, else 0 — exactly nn.Conv2d's cross-correlation
    with zero padding ksize//2.
    """
    gauss = gauss.astype(jnp.float32)
    P = ksize // 2
    ih = jnp.arange(H)
    iw = jnp.arange(W)
    dh = ih[:, None] - ih[None, :] + P          # dh[a, b] = a - b + P
    dw = iw[:, None] - iw[None, :] + P
    vh = (dh >= 0) & (dh < ksize)
    vw = (dw >= 0) & (dw < ksize)
    gh = jnp.clip(dh, 0, ksize - 1)
    gw = jnp.clip(dw, 0, ksize - 1)
    kfull = gauss[gh[:, None, :, None], gw[None, :, None, :]]     # (H, W, H, W)
    mask = vh[:, None, :, None] & vw[None, :, None, :]
    kfull = jnp.where(mask, kfull, 0.0)
    return kfull.reshape(H * W, H * W).astype(jnp.float32)


def to_kernel_layout(a: jnp.ndarray, n: int) -> jnp.ndarray:
    """NCHW -> (B, n, G, H*W): lanes = H*W (lane-dense), sublanes = G."""
    B, C, H, W = a.shape
    assert C % n == 0
    G = C // n
    return (a.astype(jnp.float32)
             .reshape(B, G, n, H, W)
             .transpose(0, 2, 1, 3, 4)
             .reshape(B, n, G, H * W))


def from_kernel_layout(a: jnp.ndarray, H: int, W: int) -> jnp.ndarray:
    """(B, n, G, H*W) -> NCHW."""
    B, n, G, HW = a.shape
    assert HW == H * W
    return (a.reshape(B, n, G, H, W)
             .transpose(0, 2, 1, 3, 4)
             .reshape(B, n * G, H, W))


def _pick_block_b(B: int, n: int, G: int, target_rows: int = 128) -> int:
    """Batch-block size: fill MXU rows but keep >= 2 grid steps for v7x's 2 TCs."""
    cap = max(1, target_rows // (n * G))
    if B >= 2:
        cap = min(cap, max(1, B // 2))
    cap = min(cap, B)
    best = 1
    for d in range(1, cap + 1):
        if B % d == 0:
            best = d
    return best


# ----------------------------------------------------------------------------
# Kernel
# ----------------------------------------------------------------------------

def make_kuramoto_kernel(n: int, gamma: float, precision):
    def kernel(omega_ref, x_ref, stim_ref, k2d_ref, out_ref):
        # omega_ref: SMEM (n, n)              -- already clamped in the wrapper
        # x_ref    : VMEM (Bb, n, G, H*W)     -- state, lane-dense layout
        # stim_ref : VMEM (Bb, n, G, H*W)
        # k2d_ref  : VMEM (H*W, H*W)          -- conv band matrix (constant)
        # out_ref  : VMEM (Bb, n, G, H*W)
        x = x_ref[...]                              # (Bb, n, G, HW)
        bb, _, g, hw = x.shape

        # Depthwise Gaussian conv for every (batch, oscillator, group) row in a
        # single MXU matmul.  The reshape only merges sublane-aligned leading
        # dims (G = 8), so it is a free re-interpretation of the tile layout.
        conv = jnp.dot(
            x.reshape(bb * n * g, hw), k2d_ref[...],
            preferred_element_type=jnp.float32,
            precision=precision,
        ).reshape(bb, n, g, hw)

        y_base = stim_ref[...] + conv               # conv / stim die here
        xs = [x[:, i] for i in range(n)]            # each (Bb, G, HW)

        # y_raw[m] = y_base[:, m] + sum_i omega[i, m] * x_i ; the tangent
        # projection dot product is accumulated in the same pass so each
        # oscillator's intermediates die as early as possible.
        y_raw = []
        dot = None
        for m_idx in range(n):
            acc = y_base[:, m_idx]
            for i in range(n):
                acc = acc + omega_ref[i, m_idx] * xs[i]
            y_raw.append(acc)
            contrib = acc * xs[m_idx]
            dot = contrib if dot is None else dot + contrib

        # Euler step + accumulate squared group norm.
        x_new = []
        sumsq = None
        for i in range(n):
            xn = xs[i] + gamma * (y_raw[i] - dot * xs[i])
            x_new.append(xn)
            sq = xn * xn
            sumsq = sq if sumsq is None else sumsq + sq

        # Per-group L2 normalization: rsqrt on the EUP + a single zero guard
        # (matches reference: zero-norm group -> zeros via nan_to_num).
        inv = jnp.where(sumsq > 0.0, lax.rsqrt(sumsq), 0.0)
        for i in range(n):
            out_ref[:, i] = x_new[i] * inv

    return kernel


# ----------------------------------------------------------------------------
# Wrappers
# ----------------------------------------------------------------------------

def kuramoto_step_kernel_layout(xk, stim_k, omega, k2d, *, n=2, gamma=0.01,
                                block_b=None,
                                conv_precision=lax.Precision.HIGHEST):
    """One Kuramoto step on kernel-layout state (B, n, G, H*W).

    Use this directly (with to/from_kernel_layout at sequence boundaries) when
    iterating the cell, so layout conversion / conv-matrix build stay out of
    the per-step path.
    """
    B, n_, G, HW = xk.shape
    assert n_ == n
    assert G % 8 == 0 and HW % 128 == 0, "need sublane/lane aligned (G, H*W) tiles"
    assert k2d.shape == (HW, HW)
    # Dense (HW, HW) conv matrix is only sensible for small images (density 49/HW).
    assert HW <= 2048, "dense conv matrix would blow VMEM; see TODO(synk) in header"

    if block_b is None:
        block_b = _pick_block_b(B, n, G)
    assert B % block_b == 0
    grid = (B // block_b,)

    # Explicit scoped-VMEM budget: (x + stim + out) blocks double-buffered,
    # double-buffered k2d, plus slack for compiler scratch / spills.
    block_bytes = block_b * n * G * HW * 4
    k2d_bytes = HW * HW * 4
    vmem_limit = 3 * 2 * block_bytes + 2 * k2d_bytes + (8 << 20)
    vmem_limit = int(min(max(vmem_limit, 16 << 20), 48 << 20))

    omg = jnp.clip(omega, -1.0, 1.0).astype(jnp.float32)

    blk = pl.BlockSpec((block_b, n, G, HW), lambda b: (b, 0, 0, 0))

    # TODO(synk): input_output_aliases={1: 0} to donate the state buffer when
    # the caller iterates under jit.
    return pl.pallas_call(
        make_kuramoto_kernel(n, gamma, conv_precision),
        out_shape=jax.ShapeDtypeStruct((B, n, G, HW), jnp.float32),
        grid=grid,
        in_specs=[
            pl.BlockSpec(memory_space=pltpu.MemorySpace.SMEM),   # omega (n, n)
            blk,                                                 # state
            blk,                                                 # stimulus
            pl.BlockSpec((HW, HW), lambda b: (0, 0)),            # conv matrix
        ],
        out_specs=blk,
        compiler_params=pltpu.CompilerParams(
            dimension_semantics=("parallel",),
            vmem_limit_bytes=vmem_limit,
        ),
    )(omg, xk.astype(jnp.float32), stim_k.astype(jnp.float32), k2d)


def kuramoto_cell_forward(x, stimulus, omega, gauss, *, n=2, gamma=0.01, ksize=7,
                          **kwargs):
    """NCHW convenience wrapper (single step) of KuramotoCell.forward."""
    B, C, H, W = x.shape
    assert C % n == 0
    k2d = conv_matrix(gauss, H, W, ksize)
    xk = to_kernel_layout(x, n)
    sk = to_kernel_layout(stimulus, n)
    out_k = kuramoto_step_kernel_layout(xk, sk, omega, k2d, n=n, gamma=gamma, **kwargs)
    return from_kernel_layout(out_k, H, W)


# ----------------------------------------------------------------------------
# Pure-JAX reference (mirrors the PyTorch module) for validation
# ----------------------------------------------------------------------------

def reference_forward(x, stimulus, omega, gauss, *, n=2, gamma=0.01, ksize=7):
    B, C, H, W = x.shape
    omg = jnp.clip(omega, -1.0, 1.0)
    w = jnp.tile(gauss.reshape(1, 1, ksize, ksize), (C, 1, 1, 1))   # (C,1,K,K)
    conv = lax.conv_general_dilated(
        x, w, window_strides=(1, 1),
        padding=[(ksize // 2, ksize // 2)] * 2,
        dimension_numbers=("NCHW", "OIHW", "NCHW"),
        feature_group_count=C,
        precision=lax.Precision.HIGHEST)
    xg = x.reshape(B, C // n, n, H, W)
    omega_y = jnp.einsum("nm,bgnhw->bgmhw", omg, xg,
                         precision=lax.Precision.HIGHEST).reshape(B, C, H, W)
    y_raw = omega_y + stimulus + conv
    yg = y_raw.reshape(B, C // n, n, H, W)
    dot = jnp.sum(yg * xg, axis=2, keepdims=True)
    y = yg - dot * xg
    x_new = xg + gamma * y
    norm = jnp.sqrt(jnp.sum(x_new * x_new, axis=2, keepdims=True))
    return jnp.nan_to_num(x_new / norm).reshape(B, C, H, W)


if __name__ == "__main__":
    # Module defaults: n=2, ch=16, gamma=0.01, ksize=7, sigma=2.0
    n, ch, gamma, ksize, sigma = 2, 16, 0.01, 7, 2.0
    B, H, W = 2, 16, 16

    key = jax.random.PRNGKey(0)
    k_omega, k_x, k_stim = jax.random.split(key, 3)

    # OmegaLayer parameter: antisymmetric (1, n, n) -> take block 0 (global omega)
    raw = jax.random.normal(k_omega, (1, n, n), jnp.float32) * 0.05 / math.sqrt(2.0)
    omega = (raw - jnp.swapaxes(raw, -2, -1))[0]            # (n, n)

    gauss = gaussian_kernel_2d(ksize, sigma)                # (ksize, ksize)

    x = jax.random.normal(k_x, (B, ch, H, W), jnp.float32)
    stimulus = 0.1 * jax.random.normal(k_stim, (B, ch, H, W), jnp.float32)

    # --- single step through the NCHW convenience wrapper --------------------
    out = kuramoto_cell_forward(x, stimulus, omega, gauss,
                                n=n, gamma=gamma, ksize=ksize)
    out = jax.block_until_ready(out)
    ref = jax.block_until_ready(
        reference_forward(x, stimulus, omega, gauss, n=n, gamma=gamma, ksize=ksize))
    assert out.shape == (B, ch, H, W)
    err1 = float(jnp.max(jnp.abs(out - ref)))
    assert err1 < 1e-4, f"single-step mismatch: {err1}"

    # --- iterated NCA use: state stays in kernel layout between steps --------
    steps = 3
    k2d = conv_matrix(gauss, H, W, ksize)                   # built once
    step = jax.jit(lambda xk, sk, omg, kk: kuramoto_step_kernel_layout(
        xk, sk, omg, kk, n=n, gamma=gamma))
    xk = to_kernel_layout(x, n)
    sk = to_kernel_layout(stimulus, n)
    for _ in range(steps):
        xk = step(xk, sk, omega, k2d)
    out_multi = jax.block_until_ready(from_kernel_layout(xk, H, W))

    ref_multi = x
    for _ in range(steps):
        ref_multi = reference_forward(ref_multi, stimulus, omega, gauss,
                                      n=n, gamma=gamma, ksize=ksize)
    ref_multi = jax.block_until_ready(ref_multi)
    err2 = float(jnp.max(jnp.abs(out_multi - ref_multi)))
    assert err2 < 1e-4, f"multi-step mismatch: {err2}"

    print("KERNEL_OK")
</pallas_src>

<mosaic_0001>
module attributes {stable_mosaic.version = 11 : i64} {
  func.func @kernel(%arg0: i32, %arg1: memref<2x2xf32, #tpu.memory_space<smem>>, %arg2: memref<1x2x8x256xf32, #tpu.memory_space<vmem>>, %arg3: memref<1x2x8x256xf32, #tpu.memory_space<vmem>>, %arg4: memref<256x256xf32, #tpu.memory_space<vmem>>, %arg5: memref<1x2x8x256xf32, #tpu.memory_space<vmem>>) attributes {dimension_semantics = [#tpu.dimension_semantics<parallel>], iteration_bounds = array<i64: 2>, scalar_prefetch = 0 : i64, scratch_operands = 0 : i64, tpu.core_type = #tpu.core_type<tc>, window_params = [{transform_indices = @transform_0, window_bounds = array<i64: 2, 2>}, {transform_indices = @transform_1, window_bounds = array<i64: 1, 2, 8, 256>}, {transform_indices = @transform_2, window_bounds = array<i64: 1, 2, 8, 256>}, {pipeline_mode = #tpu.pipeline_mode<synchronous>, transform_indices = @transform_3, window_bounds = array<i64: 256, 256>}, {transform_indices = @transform_4, window_bounds = array<i64: 1, 2, 8, 256>}]} {
    %c0 = arith.constant 0 : index
    %c0_0 = arith.constant 0 : index
    %c0_1 = arith.constant 0 : index
    %c0_2 = arith.constant 0 : index
    %0 = vector.load %arg2[%c0, %c0_0, %c0_1, %c0_2] : memref<1x2x8x256xf32, #tpu.memory_space<vmem>>, vector<1x2x8x256xf32>
    %1 = vector.shape_cast %0 : vector<1x2x8x256xf32> to vector<16x256xf32>
    %c0_3 = arith.constant 0 : index
    %c0_4 = arith.constant 0 : index
    %2 = vector.load %arg4[%c0_3, %c0_4] : memref<256x256xf32, #tpu.memory_space<vmem>>, vector<256x256xf32>
    %cst = arith.constant dense<0.000000e+00> : vector<16x256xf32>
    %3 = tpu.matmul %1, %2, %cst {dimension_numbers = #tpu.dot_dimension_numbers<[1], [0], [0], [1], [0, 0, 1, 1], [], []>, precision = #tpu.contract_precision<fp32>} : vector<16x256xf32>, vector<256x256xf32>, vector<16x256xf32> -> vector<16x256xf32>
    %4 = vector.shape_cast %3 : vector<16x256xf32> to vector<1x2x8x256xf32>
    %c0_5 = arith.constant 0 : index
    %c0_6 = arith.constant 0 : index
    %c0_7 = arith.constant 0 : index
    %c0_8 = arith.constant 0 : index
    %5 = vector.load %arg3[%c0_5, %c0_6, %c0_7, %c0_8] : memref<1x2x8x256xf32, #tpu.memory_space<vmem>>, vector<1x2x8x256xf32>
    %6 = arith.addf %5, %4 : vector<1x2x8x256xf32>
    %7 = vector.extract_strided_slice %0 {offsets = [0, 0, 0, 0], sizes = [1, 1, 8, 256], strides = [1, 1, 1, 1]} : vector<1x2x8x256xf32> to vector<1x1x8x256xf32>
    %8 = vector.shape_cast %7 : vector<1x1x8x256xf32> to vector<1x8x256xf32>
    %9 = vector.extract_strided_slice %0 {offsets = [0, 1, 0, 0], sizes = [1, 1, 8, 256], strides = [1, 1, 1, 1]} : vector<1x2x8x256xf32> to vector<1x1x8x256xf32>
    %10 = vector.shape_cast %9 : vector<1x1x8x256xf32> to vector<1x8x256xf32>
    %11 = vector.extract_strided_slice %6 {offsets = [0, 0, 0, 0], sizes = [1, 1, 8, 256], strides = [1, 1, 1, 1]} : vector<1x2x8x256xf32> to vector<1x1x8x256xf32>
    %12 = vector.shape_cast %11 : vector<1x1x8x256xf32> to vector<1x8x256xf32>
    %c0_9 = arith.constant 0 : index
    %c0_10 = arith.constant 0 : index
    %13 = memref.load %arg1[%c0_9, %c0_10] : memref<2x2xf32, #tpu.memory_space<smem>>
    %14 = vector.broadcast %13 : f32 to vector<1x8x256xf32>
    %15 = arith.mulf %14, %8 : vector<1x8x256xf32>
    %16 = arith.addf %12, %15 : vector<1x8x256xf32>
    %c1 = arith.constant 1 : index
    %c0_11 = arith.constant 0 : index
    %17 = memref.load %arg1[%c1, %c0_11] : memref<2x2xf32, #tpu.memory_space<smem>>
    %18 = vector.broadcast %17 : f32 to vector<1x8x256xf32>
    %19 = arith.mulf %18, %10 : vector<1x8x256xf32>
    %20 = arith.addf %16, %19 : vector<1x8x256xf32>
    %21 = arith.mulf %20, %8 : vector<1x8x256xf32>
    %22 = vector.extract_strided_slice %6 {offsets = [0, 1, 0, 0], sizes = [1, 1, 8, 256], strides = [1, 1, 1, 1]} : vector<1x2x8x256xf32> to vector<1x1x8x256xf32>
    %23 = vector.shape_cast %22 : vector<1x1x8x256xf32> to vector<1x8x256xf32>
    %c0_12 = arith.constant 0 : index
    %c1_13 = arith.constant 1 : index
    %24 = memref.load %arg1[%c0_12, %c1_13] : memref<2x2xf32, #tpu.memory_space<smem>>
    %25 = vector.broadcast %24 : f32 to vector<1x8x256xf32>
    %26 = arith.mulf %25, %8 : vector<1x8x256xf32>
    %27 = arith.addf %23, %26 : vector<1x8x256xf32>
    %c1_14 = arith.constant 1 : index
    %c1_15 = arith.constant 1 : index
    %28 = memref.load %arg1[%c1_14, %c1_15] : memref<2x2xf32, #tpu.memory_space<smem>>
    %29 = vector.broadcast %28 : f32 to vector<1x8x256xf32>
    %30 = arith.mulf %29, %10 : vector<1x8x256xf32>
    %31 = arith.addf %27, %30 : vector<1x8x256xf32>
    %32 = arith.mulf %31, %10 : vector<1x8x256xf32>
    %33 = arith.addf %21, %32 : vector<1x8x256xf32>
    %34 = arith.mulf %33, %8 : vector<1x8x256xf32>
    %35 = arith.subf %20, %34 : vector<1x8x256xf32>
    %cst_16 = arith.constant 0.00999999977 : f32
    %36 = vector.broadcast %cst_16 : f32 to vector<1x8x256xf32>
    %37 = arith.mulf %36, %35 : vector<1x8x256xf32>
    %38 = arith.addf %8, %37 : vector<1x8x256xf32>
    %39 = arith.mulf %38, %38 : vector<1x8x256xf32>
    %40 = arith.mulf %33, %10 : vector<1x8x256xf32>
    %41 = arith.subf %31, %40 : vector<1x8x256xf32>
    %cst_17 = arith.constant 0.00999999977 : f32
    %42 = vector.broadcast %cst_17 : f32 to vector<1x8x256xf32>
    %43 = arith.mulf %42, %41 : vector<1x8x256xf32>
    %44 = arith.addf %10, %43 : vector<1x8x256xf32>
    %45 = arith.mulf %44, %44 : vector<1x8x256xf32>
    %46 = arith.addf %39, %45 : vector<1x8x256xf32>
    %cst_18 = arith.constant 0.000000e+00 : f32
    %47 = vector.broadcast %cst_18 : f32 to vector<1x8x256xf32>
    %48 = arith.cmpf ogt, %46, %47 : vector<1x8x256xf32>
    %49 = math.rsqrt %46 : vector<1x8x256xf32>
    %cst_19 = arith.constant 0.000000e+00 : f32
    %50 = vector.broadcast %cst_19 : f32 to vector<1x8x256xf32>
    %51 = arith.select %48, %49, %50 : vector<1x8x256xi1>, vector<1x8x256xf32>
    %52 = arith.mulf %38, %51 : vector<1x8x256xf32>
    %c0_20 = arith.constant 0 : index
    %c0_21 = arith.constant 0 : index
    %c0_22 = arith.constant 0 : index
    %c0_23 = arith.constant 0 : index
    %53 = vector.load %arg5[%c0_20, %c0_21, %c0_22, %c0_23] : memref<1x2x8x256xf32, #tpu.memory_space<vmem>>, vector<1x1x8x256xf32>
    %54 = vector.shape_cast %53 : vector<1x1x8x256xf32> to vector<1x8x256xf32>
    %55 = vector.shape_cast %52 : vector<1x8x256xf32> to vector<1x1x8x256xf32>
    tpu.vector_store %arg5[%c0_20, %c0_21, %c0_22, %c0_23], %55 {strides = array<i32>} : memref<1x2x8x256xf32, #tpu.memory_space<vmem>>, vector<1x1x8x256xf32>,
    %56 = arith.mulf %44, %51 : vector<1x8x256xf32>
    %c0_24 = arith.constant 0 : index
    %c1_25 = arith.constant 1 : index
    %c0_26 = arith.constant 0 : index
    %c0_27 = arith.constant 0 : index
    %57 = vector.load %arg5[%c0_24, %c1_25, %c0_26, %c0_27] : memref<1x2x8x256xf32, #tpu.memory_space<vmem>>, vector<1x1x8x256xf32>
    %58 = vector.shape_cast %57 : vector<1x1x8x256xf32> to vector<1x8x256xf32>
    %59 = vector.shape_cast %56 : vector<1x8x256xf32> to vector<1x1x8x256xf32>
    tpu.vector_store %arg5[%c0_24, %c1_25, %c0_26, %c0_27], %59 {strides = array<i32>} : memref<1x2x8x256xf32, #tpu.memory_space<vmem>>, vector<1x1x8x256xf32>,
    return
  }
  func.func @transform_0(%arg0: i32) -> (i32, i32) {
    %c0_i32 = arith.constant 0 : i32
    %c0_i32_0 = arith.constant 0 : i32
    %c0_i32_1 = arith.constant 0 : i32
    return %c0_i32, %c0_i32_0 : i32, i32
  }
  func.func @transform_1(%arg0: i32) -> (i32, i32, i32, i32) {
    %c0_i32 = arith.constant 0 : i32
    %c0_i32_0 = arith.constant 0 : i32
    %c0_i32_1 = arith.constant 0 : i32
    %c0_i32_2 = arith.constant 0 : i32
    return %arg0, %c0_i32, %c0_i32_0, %c0_i32_1 : i32, i32, i32, i32
  }
  func.func @transform_2(%arg0: i32) -> (i32, i32, i32, i32) {
    %c0_i32 = arith.constant 0 : i32
    %c0_i32_0 = arith.constant 0 : i32
    %c0_i32_1 = arith.constant 0 : i32
    %c0_i32_2 = arith.constant 0 : i32
    return %arg0, %c0_i32, %c0_i32_0, %c0_i32_1 : i32, i32, i32, i32
  }
  func.func @transform_3(%arg0: i32) -> (i32, i32) {
    %c0_i32 = arith.constant 0 : i32
    %c0_i32_0 = arith.constant 0 : i32
    %c0_i32_1 = arith.constant 0 : i32
    return %c0_i32, %c0_i32_0 : i32, i32
  }
  func.func @transform_4(%arg0: i32) -> (i32, i32, i32, i32) {
    %c0_i32 = arith.constant 0 : i32
    %c0_i32_0 = arith.constant 0 : i32
    %c0_i32_1 = arith.constant 0 : i32
    %c0_i32_2 = arith.constant 0 : i32
    return %arg0, %c0_i32, %c0_i32_0, %c0_i32_1 : i32, i32, i32, i32
  }
}

</mosaic_0001>

<bundles_post_ra>
// kernel: tpu_custom_call.1
= control target key start
LH: loop header
LB: loop body
LE: loop exit
PB: predicated region body
PF: predicated region fallthrough
CT: control target
= control target key end

     0   :  { %s3766_s0 = inlined_call_operand.hbm [shape: f32[2,2], index: 0, kind: input, shape index: {}]   ;;  %s3767_s1 = inlined_call_operand.hbm [shape: f32[2,2,8,256], index: 1, kind: input, shape index: {}]   ;;  %s3768_s2 = inlined_call_operand.hbm [shape: f32[2,2,8,256], index: 2, kind: input, shape index: {}]   ;;  %s3769_s3 = inlined_call_operand.hbm [shape: f32[256,256], index: 3, kind: input, shape index: {}]   ;;  %s3770_s4 = inlined_call_operand.hbm [shape: f32[2,2,8,256], index: 4, kind: output, shape index: {}]  }
   0x1   :  { %3921 = sst [smem:[#allocation107_spill]] %s3766_s0 }
   0x2   :  { %9 = vsyncpa [#allocation5], 0 }
   0x3   :  { %10 = vsyncpa [#allocation3], 0 }
   0x4   :  { %12 = vsyncpa [#allocation3 + $0x1], 0 }
   0x5   :  { %13 = vsyncpa [#allocation8], 0 }
   0x6   :  { %15 = vsyncpa [#allocation8 + $0x1], 0 }
   0x7   :  { %16 = vsyncpa [#allocation4], 0 }
   0x8   :  { %18 = vsyncpa [#allocation4 + $0x1], 0  ;;  %s2633_s15 = smov 0   ;;  %s2635_s16 = smov 0  }
   0x9   :  { %s2637_s17 = smov 0   ;;  %s2639_s18 = smov 0  }
   0xa LB: > { %s2654_s19 = sadd.s32 4294967295, %s2597_s18   ;;  %s1902_s20 = sadd.s32 4294967294, %s2597_s18   ;;  %s2597_s18 = sphi %s2639_s18, %s4205_s18   ;;  %s2593_s17 = sphi %s2637_s17, %s4204_s17   ;;  %s2589_s16 = sphi %s2635_s16, %s4203_s16   ;;  %s2585_s15 = sphi %s2633_s15, %s4202_s15  }
   0xb   : > { %p65_p0 = scmp.ne.s32.totalorder %s2589_s16, %s2585_s15  ;;  %p3771_p1 = scmp.eq.s32.totalorder %s2654_s19, 0 }
   0xc   : > { %p142_p3 = scmp.eq.s32.totalorder %s1902_s20, 1  ;;  %p1903_p5 = scmp.ge.s32.totalorder %s2597_s18, 1 }
   0xd   : > { %p2663_p4 = por %p3771_p1, %p65_p0  ;;  %p149_p7 = scmp.lt.s32.totalorder %s2597_s18, 3 }
   0xe   : > { %p2668_p6 = por %p142_p3, %p65_p0  ;;  %s2599_s24 = smov [#allocation9]  }
   0xf   : > { %s3922_s21 = scalar_select %p2663_p4, 1, 0 }
  0x10   : > { %s3923_s22 = scalar_select %p2668_p6, 1, 0 }
  0x11   : > { %p2673_p8 = pnand %p1903_p5, %p149_p7  ;;  %s170_s25 = sshll.u32 %s2599_s24, 4  ;;  %s171_s25 = int_to_ptr.vmem [resolvable:$true] %s170_s25 }
  0x12   : > { %s2687_s27 = sadd.s32 1, %s2597_s18   ;;  %s2418_s5 = scalar_lea.hbm %s3769_s3, 8192 }
  0x13   : > { %s3924_s23 = scalar_select %p2673_p8, 1, 0 }
  0x14   : > { %p2350_p9 = pneg %p2673_p8  ;;  %s49_s28 = ssub.s32 %s2597_s18, %s2687_s27 }
  0x15   : > { %p2419_p12 = scmp.ne.s32.totalorder %s3769_s3, %s2418_s5  ;;  %p2425_p5 = scmp.lt.u32.totalorder %s2418_s5, %s3769_s3 }
  0x16   : > { %p2682_p11 = pnand %p2350_p9, %p3771_p1 }
  0x18   : > { %p2420_p13 = pneg %p2682_p11 }
  0x1a   : > { %p2421_p0 = pnand %p2420_p13, %p2419_p12 }
  0x1c   : > { %p2422_p3 = pneg %p2421_p0 }
  0x1e   : > { %p2427_p7 = pnand %p2425_p5, %p2422_p3 }
  0x20   : > { %2430 = shalt.err (!%p2427_p7)
}
  0x21   : > { %s2431_s10 = scalar_lea.vmem %s171_s25, 8192  ;;  %p2439_p2 = scmp.lt.s32.totalorder %s171_s25, %s171_s25 }
  0x22   : > { %p2432_p9 = scmp.ne.s32.totalorder %s171_s25, %s2431_s10  ;;  %p2440_p6 = scmp.lt.s32.totalorder %s2431_s10, %s2431_s10 }
  0x24   : > { %p2434_p10 = pnand %p2432_p9, %p2420_p13  ;;  %p2441_p4 = por %p2440_p6, %p2439_p2 }
  0x26   : > { %p2435_p1 = pneg %p2434_p10 }
  0x28   : > { %p2442_p8 = pnand %p2441_p4, %p2435_p1 }
  0x2a   : > { %2445 = shalt.err (!%p2442_p8)
}
  0x2b   : > { %s3774_s11 = smov 256   ;;  %s3776_s12 = smov 16  }
  0x2c   : > { %2356 = dma.hbm_to_vmem [thread:$0]  (!%p2682_p11), %s3769_s3, 8192, %s171_s25, [#allocation8], %s3774_s11, %s3774_s11, %s3776_s12  }
  0x2d   : > { %s3926_s0 = sld [smem:[#allocation107_spill]] }
  0x33   : > { %s2446_s29 = scalar_lea.hbm %s3926_s0, 32 }
  0x34   : > { %p2447_p1 = scmp.ne.s32.totalorder %s3926_s0, %s2446_s29  ;;  %p2453_p6 = scmp.lt.u32.totalorder %s2446_s29, %s3926_s0 }
  0x36   : > { %p2449_p2 = pnand %p2447_p1, %p2420_p13 }
  0x38   : > { %p2450_p4 = pneg %p2449_p2 }
  0x3a   : > { %p2455_p8 = pnand %p2453_p6, %p2450_p4 }
  0x3c   : > { %2458 = shalt.err (!%p2455_p8)
}
  0x3d   : > { %s2602_s8 = smov [#allocation2]   ;;  %p50_p10 = scmp.eq.s32.totalorder %s49_s28, 0 }
  0x3e   : > { %2353 = dma.hbm_to_smem (!%p2682_p11), %s3926_s0, 32, %s2602_s8, [#allocation5]  }
  0x3f   : > { %s52_s10 = sadd.s32 1, %s2593_s17  ;;  %p59_p12 = scmp.ne.s32.totalorder %s2593_s17, %s2589_s16 }
  0x40   : > { %p60_p13 = scmp.eq.s32.totalorder %s2597_s18, 0  ;;  %p3927_p3 = scmp.eq.s32.totalorder %s2654_s19, 1 }
  0x41   : > { %s2741_s26 = scalar_select %p50_p10, %s2593_s17, %s52_s10  }
  0x42   : > { %p61_p0 = por %p60_p13, %p59_p12  ;;  %p2745_p5 = por %p3927_p3, %p59_p12 }
  0x43   : > { %p2370_p7 = scmp.lt.s32.totalorder %s2597_s18, 2  ;;  %s184_s14 = sand.u32 1, %s2593_s17  }
  0x44   : > { %s1907_s20 = sshll.u32 %s184_s14, 5  ;;  %s1929_s24 = sshll.u32 %s2597_s18, 9 }
  0x45   : > { %s2755_s5 = scalar_lea.hbm %s3767_s1, %s1929_s24  ;;  %s188_s28 = scalar_lea.vmem [#allocation6], %s1907_s20 }
  0x46   : > { %s195_s6 = sshll.u32 %s188_s28, 4  ;;  %p2759_p11 = pnand %p2370_p7, %p61_p0  ;;  %s2757_s6 = int_to_ptr.vmem [resolvable:$true] %s195_s6 }
  0x47   : > { %s2766_s9 = scalar_lea.hbm %s3768_s2, %s1929_s24  ;;  %s209_s10 = scalar_lea.vmem [#allocation7], %s1907_s20 }
  0x48   : > { %s2768_s29 = sshll.u32 %s209_s10, 4  ;;  %s2770_s30 = scalar_lea.sflag [#allocation3], %s184_s14  ;;  %s2802_s29 = int_to_ptr.vmem [resolvable:$true] %s2768_s29 }
  0x49   : > { %s2459_s28 = scalar_lea.hbm %s2755_s5, 512  ;;  %p2461_p1 = pneg %p2759_p11 }
  0x4a   : > { %p2460_p9 = scmp.ne.s32.totalorder %s2755_s5, %s2459_s28  ;;  %s2464_s8 = scalar_lea.hbm %s3767_s1, 1024 }
  0x4b   : > { %p2465_p6 = scmp.lt.u32.totalorder %s2755_s5, %s3767_s1  ;;  %p2466_p8 = scmp.lt.u32.totalorder %s2464_s8, %s2459_s28 }
  0x4c   : > { %p2462_p2 = pnand %p2461_p1, %p2460_p9  ;;  %p2468_p12 = scmp.lt.u32.totalorder %s2459_s28, %s2755_s5 }
  0x4d   : > { %p2467_p10 = por %p2466_p8, %p2465_p6 }
  0x4e   : > { %p2463_p4 = pneg %p2462_p2 }
  0x4f   : > { %p2469_p13 = por %p2468_p12, %p2467_p10 }
  0x51   : > { %p2470_p0 = pnand %p2469_p13, %p2463_p4 }
  0x53   : > { %2473 = shalt.err (!%p2470_p0)
}
  0x54   : > { %s2474_s14 = scalar_lea.vmem %s2757_s6, 512  ;;  %s2603_s11 = smov [#allocation6]  }
  0x55   : > { %p2475_p3 = scmp.ne.s32.totalorder %s2757_s6, %s2474_s14  ;;  %s2479_s12 = sshll.u32 %s2603_s11, 4  ;;  %s2480_s12 = int_to_ptr.vmem [resolvable:$false] %s2479_s12 }
  0x56   : > { %s2481_s20 = scalar_lea.vmem %s2480_s12, 1024  ;;  %p2482_p2 = scmp.lt.s32.totalorder %s2757_s6, %s2480_s12 }
  0x57   : > { %p2477_p7 = pnand %p2475_p3, %p2461_p1  ;;  %p2483_p6 = scmp.lt.s32.totalorder %s2481_s20, %s2474_s14 }
  0x59   : > { %p2478_p9 = pneg %p2477_p7  ;;  %p2484_p8 = por %p2483_p6, %p2482_p2 }
  0x5b   : > { %p2485_p10 = pnand %p2484_p8, %p2478_p9 }
  0x5d   : > { %2488 = shalt.err (!%p2485_p10)
}
  0x5e   : > { %s3930_s10 = smov 16   ;;  %s3931_s28 = smov 256  }
  0x5f   : > { %2360 = dma.hbm_to_vmem [thread:$0]  (!%p2759_p11), %s2755_s5, 512, %s2757_s6, %s2770_s30, %s3931_s28, %s3931_s28, %s3930_s10  }
  0x60   : > { %s205_s8 = sand.u32 1, %s2597_s18   ;;  %s2489_s24 = scalar_lea.hbm %s2766_s9, 512 }
  0x61   : > { %s2805_s25 = scalar_lea.sflag [#allocation8], %s205_s8  ;;  %p2490_p4 = scmp.ne.s32.totalorder %s2766_s9, %s2489_s24 }
  0x62   : > { %s2494_s12 = scalar_lea.hbm %s3768_s2, 1024  ;;  %p2495_p0 = scmp.lt.u32.totalorder %s2766_s9, %s3768_s2 }
  0x63   : > { %p2492_p12 = pnand %p2490_p4, %p2461_p1  ;;  %p2496_p3 = scmp.lt.u32.totalorder %s2494_s12, %s2489_s24 }
  0x64   : > { %p2498_p9 = scmp.lt.u32.totalorder %s2489_s24, %s2766_s9 }
  0x65   : > { %p2493_p13 = pneg %p2492_p12  ;;  %p2497_p7 = por %p2496_p3, %p2495_p0 }
  0x67   : > { %p2499_p2 = por %p2498_p9, %p2497_p7 }
  0x69   : > { %p2500_p6 = pnand %p2499_p2, %p2493_p13 }
  0x6b   : > { %2503 = shalt.err (!%p2500_p6)
}
  0x6c   : > { %s2504_s5 = scalar_lea.vmem %s2802_s29, 512  ;;  %s2604_s6 = smov [#allocation7]  }
  0x6d   : > { %p2505_p8 = scmp.ne.s32.totalorder %s2802_s29, %s2504_s5  ;;  %s2509_s30 = sshll.u32 %s2604_s6, 4  ;;  %s2510_s30 = int_to_ptr.vmem [resolvable:$false] %s2509_s30 }
  0x6e   : > { %s2511_s0 = scalar_lea.vmem %s2510_s30, 1024  ;;  %p2512_p12 = scmp.lt.s32.totalorder %s2802_s29, %s2510_s30 }
  0x6f   : > { %p2507_p10 = pnand %p2505_p8, %p2461_p1  ;;  %p2513_p0 = scmp.lt.s32.totalorder %s2511_s0, %s2504_s5 }
  0x71   : > { %p2508_p4 = pneg %p2507_p10  ;;  %p2514_p3 = por %p2513_p0, %p2512_p12 }
  0x73   : > { %p2515_p7 = pnand %p2514_p3, %p2508_p4 }
  0x75   : > { %2518 = shalt.err (!%p2515_p7)
}
  0x76   : > { %2363 = dma.hbm_to_vmem [thread:$0]  (!%p2759_p11), %s2766_s9, 512, %s2802_s29, %s2805_s25, %s3931_s28, %s3931_s28, %s3930_s10  }
  0x77   : > { %p3932_p1 = scmp.ne.s32.totalorder %s3924_s23, 0 }
  0x79   : > { %228 = sbr.rel (%p3932_p1) target bundleno = 614 (0x266), region = 36 }
  0x80   : > { %p3933_p13 = scmp.eq.s32.totalorder %s2654_s19, 0 }
  0x82   : > { %2564 = dma.done.wait (%p3933_p13), [#allocation5], 32   ;;  %p3934_p9 = pmov %p3933_p13 }
  0x83   : > { %s2841_s8 = sand.u32 1, %s2589_s16   ;;  %p3935_p11 = scmp.ne.s32.totalorder %s3922_s21, 0 }
  0x84   : > { %2566 = vsyncadd (%p3934_p9), [#allocation5], 4294967264  ;;  %s2844_s7 = sshll.u32 %s2841_s8, 5  ;;  %s235_s24 = scalar_lea.sflag [#allocation3], %s2841_s8 }
  0x85   : > { %s2848_s9 = scalar_lea.vmem [#allocation6], %s2844_s7 }
  0x86   : > { %2568 = dma.done.wait (%p3935_p11), %s235_s24, 512  }
  0x87   : > { %2570 = vsyncadd (%p3935_p11), %s235_s24, 4294966784  ;;  %s243_s23 = sand.u32 1, %s2654_s19   ;;  %s2856_s10 = scalar_lea.vmem [#allocation7], %s2844_s7 }
  0x88   : > { %s244_s29 = scalar_lea.sflag [#allocation8], %s243_s23 }
  0x89   : > { %2572 = dma.done.wait (%p3935_p11), %s244_s29, 512  }
  0x8a   : > { %2574 = vsyncadd (%p3935_p11), %s244_s29, 4294966784  ;;  %p3936_p2 = pmov %p3934_p9 }
  0x8c   : > { %2576 = dma.done.wait (%p3936_p2), [#allocation8], 8192   ;;  %p3937_p6 = pmov %p3936_p2 }
  0x8e   : > { %2578 = vsyncadd (%p3937_p6), [#allocation8], 4294959104 }
  0x8f   : > { %256 = sfence }
  0x90   : > { %v287_v0 = vld [vmem:[#allocation9 + $0x8] sm:$0xff]  ;;  %v289_v1 = vld [vmem:[#allocation9 + $0x18] sm:$0xff]  ;;  %v286_v2 = vld [vmem:[#allocation9] sm:$0xff]  ;;  %s1704_s21 = sld [smem:[#allocation2]]  ;;  %s3692_s25 = sld [smem:[#allocation2 + $0x1]] }
  0x91   : > { %v350_v3 = vand.u32 4294901760, %v287_v0  ;;  %v354_v4 = vand.u32 4294901760, %v289_v1  ;;  %v288_v5 = vld [vmem:[#allocation9 + $0x10] sm:$0xff]  ;;  %v352_v6 = vand.u32 4294901760, %v286_v2  ;;  %v291_v7 = vld [vmem:[#allocation9 + $0x28] sm:$0xff]  ;;  %v293_v8 = vld [vmem:[#allocation9 + $0x38] sm:$0xff] }
  0x92   : > { %v356_v9 = vand.u32 4294901760, %v288_v5  ;;  %v358_v10 = vand.u32 4294901760, %v291_v7  ;;  %v362_v11 = vand.u32 4294901760, %v293_v8  ;;  %v290_v12 = vld [vmem:[#allocation9 + $0x20] sm:$0xff]  ;;  %v292_v13 = vld [vmem:[#allocation9 + $0x30] sm:$0xff]  ;;  %v295_v14 = vld [vmem:[#allocation9 + $0x48] sm:$0xff] }
  0x93   : > { %v2866_v15 = vpack.c.bf16 %v354_v4, %v350_v3  ;;  %v297_v16 = vld [vmem:[#allocation9 + $0x58] sm:$0xff]  ;;  %v294_v17 = vld [vmem:[#allocation9 + $0x40] sm:$0xff]  ;;  %v296_v18 = vld [vmem:[#allocation9 + $0x50] sm:$0xff]  ;;  %v360_v23 = vand.u32 4294901760, %v290_v12  ;;  %v364_v24 = vand.u32 4294901760, %v292_v13  ;;  %v366_v25 = vand.u32 4294901760, %v295_v14 }
  0x94   : > { %v2868_v19 = vpack.c.bf16 %v356_v9, %v352_v6  ;;  %v2870_v20 = vpack.c.bf16 %v362_v11, %v358_v10  ;;  %v299_v21 = vld [vmem:[#allocation9 + $0x68] sm:$0xff]  ;;  %v301_v22 = vld [vmem:[#allocation9 + $0x78] sm:$0xff]  ;;  %v2874_v26 = vsub.f32 %v287_v0, %v350_v3  ;;  %v370_v27 = vand.u32 4294901760, %v297_v16  ;;  %v298_v34 = vld [vmem:[#allocation9 + $0x60] sm:$0xff]  ;;  %s3690_s28 = sld [smem:[#allocation2 + $0x80]]  ;;  %s3694_s14 = sld [smem:[#allocation2 + $0x81]] }
  0x95   : > { %3938 = vst [vmem:[#allocation16_spill] sm:$0xff] %v2866_v15  ;;  %1933 = vmatprep.subr.bf16.mxu1 %v2866_v15  ;;  %2125 = vmatprep.subr.bf16.mxu0 %v2866_v15  ;;  %v368_v28 = vand.u32 4294901760, %v294_v17  ;;  %v372_v29 = vand.u32 4294901760, %v296_v18  ;;  %v2878_v30 = vsub.f32 %v289_v1, %v354_v4  ;;  %v2882_v31 = vpack.c.bf16 %v364_v24, %v360_v23  ;;  %v300_v35 = vld [vmem:[#allocation9 + $0x70] sm:$0xff]  ;;  %v303_v36 = vld [vmem:[#allocation9 + $0x88] sm:$0xff]  ;;  %v305_v41 = vld [vmem:[#allocation9 + $0x98] sm:$0xff] }
  0x96   : > { %3939 = vst [vmem:[#allocation17_spill] sm:$0xff] %v2868_v19  ;;  %3940 = vst [vmem:[#allocation18_spill] sm:$0xff] %v2870_v20  ;;  %1935 = vmatpush1.bf16.msra.mxu1 %v2868_v19  ;;  %2127 = vmatpush1.bf16.msra.mxu0 %v2868_v19  ;;  %v374_v32 = vand.u32 4294901760, %v299_v21  ;;  %v378_v33 = vand.u32 4294901760, %v301_v22  ;;  %v2884_v37 = vsub.f32 %v286_v2, %v352_v6  ;;  %v302_v42 = vld [vmem:[#allocation9 + $0x80] sm:$0xff]  ;;  %v304_v43 = vld [vmem:[#allocation9 + $0x90] sm:$0xff] }
  0x97   : > { %3941 = vst [vmem:[#allocation19_spill] sm:$0xff] %v2874_v26  ;;  %3942 = vst [vmem:[#allocation20_spill] sm:$0xff] %v2878_v30  ;;  %1937 = vmatprep.subr.bf16.mxu1 %v2870_v20  ;;  %2129 = vmatprep.subr.bf16.mxu0 %v2870_v20  ;;  %v2886_v38 = vsub.f32 %v288_v5, %v356_v9  ;;  %v2888_v39 = vsub.f32 %v291_v7, %v358_v10  ;;  %v376_v49 = vand.u32 4294901760, %v298_v34  ;;  %v307_v52 = vld [vmem:[#allocation9 + $0xa8] sm:$0xff]  ;;  %v309_v57 = vld [vmem:[#allocation9 + $0xb8] sm:$0xff]  ;;  %s1931_s11 = sshll.u32 %s2654_s19, 9 }
  0x98   : > { %3943 = vst [vmem:[#allocation21_spill] sm:$0xff] %v2882_v31  ;;  %3944 = vst [vmem:[#allocation22_spill] sm:$0xff] %v2884_v37  ;;  %v2890_v40 = vpack.c.bf16 %v370_v27, %v366_v25  ;;  %v2892_v44 = vsub.f32 %v293_v8, %v362_v11  ;;  %v2894_v45 = vsub.f32 %v290_v12, %v360_v23  ;;  %v380_v50 = vand.u32 4294901760, %v300_v35  ;;  %v306_v62 = vld [vmem:[#allocation9 + $0xa0] sm:$0xff]  ;;  %v308_v3 = vld [vmem:[#allocation9 + $0xb0] sm:$0xff]  ;;  %s281_s12 = scalar_lea.vmem [#allocation10], %s2844_s7  ;;  %s3720_s30 = scalar_lea.hbm %s3770_s4, %s1931_s11 }
  0x99   : > { %3945 = vst [vmem:[#allocation23_spill] sm:$0xff] %v2886_v38  ;;  %3946 = vst [vmem:[#allocation24_spill] sm:$0xff] %v2888_v39  ;;  %v2896_v46 = vsub.f32 %v292_v13, %v364_v24  ;;  %v2898_v47 = vsub.f32 %v295_v14, %v366_v25  ;;  %v2902_v48 = vpack.c.bf16 %v372_v29, %v368_v28  ;;  %v382_v51 = vand.u32 4294901760, %v303_v36  ;;  %v311_v4 = vld [vmem:[#allocation9 + $0xc8] sm:$0xff]  ;;  %v313_v5 = vld [vmem:[#allocation9 + $0xd8] sm:$0xff]  ;;  %s1785_s20 = sshll.u32 %s281_s12, 4  ;;  %s3722_s20 = int_to_ptr.vmem [resolvable:$true] %s1785_s20 }
  0x9a   : > { %3947 = vst [vmem:[#allocation25_spill] sm:$0xff] %v2890_v40  ;;  %3948 = vst [vmem:[#allocation26_spill] sm:$0xff] %v2892_v44  ;;  %1939 = vmatpush1.bf16.msra.mxu1 %v2882_v31  ;;  %2131 = vmatpush1.bf16.msra.mxu0 %v2882_v31  ;;  %v2906_v53 = vpack.c.bf16 %v378_v33, %v374_v32  ;;  %v386_v54 = vand.u32 4294901760, %v305_v41  ;;  %v384_v55 = vand.u32 4294901760, %v302_v42  ;;  %v388_v56 = vand.u32 4294901760, %v304_v43  ;;  %v310_v10 = vld [vmem:[#allocation9 + $0xc0] sm:$0xff] }
  0x9b   : > { %3949 = vst [vmem:[#allocation27_spill] sm:$0xff] %v2902_v48  ;;  %1941 = vmatprep.subr.bf16.mxu1 %v2890_v40  ;;  %2133 = vmatprep.subr.bf16.mxu0 %v2890_v40  ;;  %v2908_v58 = vsub.f32 %v297_v16, %v370_v27  ;;  %v2910_v59 = vsub.f32 %v294_v17, %v368_v28  ;;  %v390_v2 = vand.u32 4294901760, %v307_v52  ;;  %v394_v9 = vand.u32 4294901760, %v309_v57  ;;  %v312_v11 = vld [vmem:[#allocation9 + $0xd0] sm:$0xff]  ;;  %v315_v16 = vld [vmem:[#allocation9 + $0xe8] sm:$0xff]  ;;  %v317_v17 = vld [vmem:[#allocation9 + $0xf8] sm:$0xff] }
  0x9c   : > { %3950 = vst [vmem:[#allocation28_spill] sm:$0xff] %v2906_v53  ;;  %v2912_v60 = vsub.f32 %v296_v18, %v372_v29  ;;  %v2914_v61 = vsub.f32 %v299_v21, %v374_v32  ;;  %v2916_v63 = vsub.f32 %v301_v22, %v378_v33  ;;  %v2918_v0 = vpack.c.bf16 %v380_v50, %v376_v49  ;;  %v314_v24 = vld [vmem:[#allocation9 + $0xe0] sm:$0xff]  ;;  %v316_v25 = vld [vmem:[#allocation9 + $0xf0] sm:$0xff]  ;;  %s1772_s19 = scalar_lea.sflag [#allocation4], %s2841_s8  ;;  %s2519_s0 = scalar_lea.vmem %s3722_s20, 512 }
  0x9d   : > { %3951 = vst [vmem:[#allocation29_spill] sm:$0xff] %v2908_v58  ;;  %v2920_v1 = vsub.f32 %v298_v34, %v376_v49  ;;  %v2924_v6 = vsub.f32 %v300_v35, %v380_v50  ;;  %v2926_v7 = vpack.c.bf16 %v386_v54, %v382_v51  ;;  %v2928_v8 = vsub.f32 %v303_v36, %v382_v51  ;;  %v319_v36 = vld [vmem:[#allocation9 + $0x108] sm:$0xff]  ;;  %v318_v51 = vld [vmem:[#allocation9 + $0x100] sm:$0xff]  ;;  %v328_v19 = vld [vmem:[#allocation9 + $0x150] sm:$0xff]  ;;  %p2520_p8 = scmp.ne.s32.totalorder %s3722_s20, %s2519_s0  ;;  %s2605_s7 = smov [#allocation10]  }
  0x9e   : > { %3952 = vst [vmem:[#allocation30_spill] sm:$0xff] %v2912_v60  ;;  %3953 = vst [vmem:[#allocation31_spill] sm:$0xff] %v2914_v61  ;;  %1943 = vmatpush1.bf16.msra.mxu1 %v2902_v48  ;;  %2135 = vmatpush1.bf16.msra.mxu0 %v2902_v48  ;;  %v2932_v12 = vsub.f32 %v305_v41, %v386_v54  ;;  %v2934_v13 = vpack.c.bf16 %v388_v56, %v384_v55  ;;  %v392_v18 = vand.u32 4294901760, %v306_v62  ;;  %v321_v41 = vld [vmem:[#allocation9 + $0x118] sm:$0xff]  ;;  %v326_v20 = vld [vmem:[#allocation9 + $0x140] sm:$0xff]  ;;  %s2523_s24 = sshll.u32 %s2605_s7, 4  ;;  %s2524_s24 = int_to_ptr.vmem [resolvable:$false] %s2523_s24 }
  0x9f   : > { %3954 = vst [vmem:[#allocation32_spill] sm:$0xff] %v2916_v63  ;;  %3955 = vst [vmem:[#allocation33_spill] sm:$0xff] %v2918_v0  ;;  %1945 = vmatprep.subr.bf16.mxu1 %v2906_v53  ;;  %2137 = vmatprep.subr.bf16.mxu0 %v2906_v53  ;;  %v2936_v14 = vsub.f32 %v302_v42, %v384_v55  ;;  %v396_v21 = vand.u32 4294901760, %v308_v3  ;;  %v398_v22 = vand.u32 4294901760, %v311_v4  ;;  %v402_v23 = vand.u32 4294901760, %v313_v5  ;;  %v325_v53 = vld [vmem:[#allocation9 + $0x138] sm:$0xff]  ;;  %p2521_p10 = pnand %p2520_p8, %p2745_p5  ;;  %p2526_p12 = scmp.lt.s32.totalorder %s3722_s20, %s2524_s24 }
  0xa0   : > { %3956 = vst [vmem:[#allocation34_spill] sm:$0xff] %v2920_v1  ;;  %3957 = vst [vmem:[#allocation35_spill] sm:$0xff] %v2924_v6  ;;  %v2938_v27 = vsub.f32 %v304_v43, %v388_v56  ;;  %v2940_v28 = vsub.f32 %v307_v52, %v390_v2  ;;  %v400_v29 = vand.u32 4294901760, %v310_v10  ;;  %v404_v32 = vand.u32 4294901760, %v312_v11 }
  0xa1   : > { %3958 = vst [vmem:[#allocation36_spill] sm:$0xff] %v2926_v7  ;;  %3959 = vst [vmem:[#allocation37_spill] sm:$0xff] %v2928_v8  ;;  %v2944_v33 = vpack.c.bf16 %v394_v9, %v390_v2  ;;  %v2946_v34 = vsub.f32 %v309_v57, %v394_v9  ;;  %v2948_v35 = vsub.f32 %v306_v62, %v392_v18  ;;  %v406_v42 = vand.u32 4294901760, %v315_v16  ;;  %v320_v57 = vld [vmem:[#allocation9 + $0x110] sm:$0xff]  ;;  %p2522_p4 = pneg %p2521_p10 }
  0xa2   : > { %3960 = vst [vmem:[#allocation38_spill] sm:$0xff] %v2932_v12  ;;  %3961 = vst [vmem:[#allocation39_spill] sm:$0xff] %v2934_v13  ;;  %1947 = vmatpush1.bf16.msra.mxu1 %v2918_v0  ;;  %2139 = vmatpush1.bf16.msra.mxu0 %v2918_v0  ;;  %v410_v43 = vand.u32 4294901760, %v317_v17  ;;  %v408_v49 = vand.u32 4294901760, %v314_v24  ;;  %v412_v50 = vand.u32 4294901760, %v316_v25  ;;  %v2952_v52 = vpack.c.bf16 %v396_v21, %v392_v18  ;;  %v323_v0 = vld [vmem:[#allocation9 + $0x128] sm:$0xff] }
  0xa3   : > { %3962 = vst [vmem:[#allocation40_spill] sm:$0xff] %v2936_v14  ;;  %3963 = vst [vmem:[#allocation41_spill] sm:$0xff] %v2938_v27  ;;  %1949 = vmatprep.subr.bf16.mxu1 %v2926_v7  ;;  %2141 = vmatprep.subr.bf16.mxu0 %v2926_v7  ;;  %v2954_v54 = vsub.f32 %v308_v3, %v396_v21  ;;  %v2956_v55 = vpack.c.bf16 %v402_v23, %v398_v22  ;;  %v414_v9 = vand.u32 4294901760, %v319_v36 }
  0xa4   : > { %3964 = vst [vmem:[#allocation42_spill] sm:$0xff] %v2940_v28  ;;  %3965 = vst [vmem:[#allocation43_spill] sm:$0xff] %v2944_v33  ;;  %v2958_v56 = vsub.f32 %v311_v4, %v398_v22  ;;  %v2960_v62 = vsub.f32 %v313_v5, %v402_v23  ;;  %v2962_v2 = vpack.c.bf16 %v404_v32, %v400_v29  ;;  %v418_v7 = vand.u32 4294901760, %v321_v41  ;;  %v322_v22 = vld [vmem:[#allocation9 + $0x120] sm:$0xff]  ;;  %v324_v5 = vld [vmem:[#allocation9 + $0x130] sm:$0xff] }
  0xa5   : > { %3966 = vst [vmem:[#allocation44_spill] sm:$0xff] %v2946_v34  ;;  %3967 = vst [vmem:[#allocation45_spill] sm:$0xff] %v2948_v35  ;;  %v2966_v18 = vsub.f32 %v310_v10, %v400_v29  ;;  %v2968_v3 = vsub.f32 %v312_v11, %v404_v32  ;;  %v2970_v21 = vsub.f32 %v315_v16, %v406_v42  ;;  %v416_v4 = vand.u32 4294901760, %v318_v51  ;;  %v327_v10 = vld [vmem:[#allocation9 + $0x148] sm:$0xff]  ;;  %v329_v29 = vld [vmem:[#allocation9 + $0x158] sm:$0xff] }
  0xa6   : > { %3968 = vst [vmem:[#allocation46_spill] sm:$0xff] %v2952_v52  ;;  %3969 = vst [vmem:[#allocation47_spill] sm:$0xff] %v2954_v54  ;;  %1951 = vmatpush1.bf16.msra.mxu1 %v2934_v13  ;;  %2143 = vmatpush1.bf16.msra.mxu0 %v2934_v13  ;;  %v2974_v23 = vpack.c.bf16 %v410_v43, %v406_v42  ;;  %v2976_v48 = vsub.f32 %v317_v17, %v410_v43  ;;  %v420_v13 = vand.u32 4294901760, %v320_v57  ;;  %v331_v43 = vld [vmem:[#allocation9 + $0x168] sm:$0xff] }
  0xa7   : > { %3970 = vst [vmem:[#allocation48_spill] sm:$0xff] %v2956_v55  ;;  %3971 = vst [vmem:[#allocation49_spill] sm:$0xff] %v2958_v56  ;;  %1953 = vmatprep.subr.bf16.mxu1 %v2944_v33  ;;  %2145 = vmatprep.subr.bf16.mxu0 %v2944_v33  ;;  %v2978_v40 = vpack.c.bf16 %v412_v50, %v408_v49  ;;  %v2980_v11 = vsub.f32 %v314_v24, %v408_v49  ;;  %v422_v32 = vand.u32 4294901760, %v323_v0 }
  0xa8   : > { %3972 = vst [vmem:[#allocation50_spill] sm:$0xff] %v2960_v62  ;;  %3973 = vst [vmem:[#allocation51_spill] sm:$0xff] %v2962_v2  ;;  %v2982_v16 = vsub.f32 %v316_v25, %v412_v50  ;;  %v426_v31 = vand.u32 4294901760, %v325_v53  ;;  %v2984_v15 = vpack.c.bf16 %v418_v7, %v414_v9  ;;  %v2986_v33 = vsub.f32 %v319_v36, %v414_v9 }
  0xa9   : > { %3974 = vst [vmem:[#allocation52_spill] sm:$0xff] %v2966_v18  ;;  %3975 = vst [vmem:[#allocation53_spill] sm:$0xff] %v2968_v3  ;;  %v424_v42 = vand.u32 4294901760, %v322_v22  ;;  %v428_v17 = vand.u32 4294901760, %v324_v5  ;;  %v2990_v24 = vsub.f32 %v321_v41, %v418_v7  ;;  %v2992_v25 = vsub.f32 %v318_v51, %v416_v4 }
  0xaa   : > { %3976 = vst [vmem:[#allocation54_spill] sm:$0xff] %v2970_v21  ;;  %3977 = vst [vmem:[#allocation55_spill] sm:$0xff] %v2974_v23  ;;  %1955 = vmatpush1.bf16.msra.mxu1 %v2952_v52  ;;  %2147 = vmatpush1.bf16.msra.mxu0 %v2952_v52  ;;  %v430_v49 = vand.u32 4294901760, %v327_v10  ;;  %v434_v50 = vand.u32 4294901760, %v329_v29  ;;  %v2996_v36 = vpack.c.bf16 %v420_v13, %v416_v4  ;;  %v332_v21 = vld [vmem:[#allocation9 + $0x170] sm:$0xff]  ;;  %v438_v41 = vand.u32 4294901760, %v331_v43 }
  0xab   : > { %3978 = vst [vmem:[#allocation56_spill] sm:$0xff] %v2976_v48  ;;  %3979 = vst [vmem:[#allocation57_spill] sm:$0xff] %v2978_v40  ;;  %v333_v48 = vld [vmem:[#allocation9 + $0x178] sm:$0xff]  ;;  %1957 = vmatprep.subr.bf16.mxu1 %v2956_v55  ;;  %2149 = vmatprep.subr.bf16.mxu0 %v2956_v55  ;;  %v2998_v9 = vsub.f32 %v320_v57, %v420_v13  ;;  %v3000_v3 = vpack.c.bf16 %v426_v31, %v422_v32  ;;  %v335_v52 = vld [vmem:[#allocation9 + $0x188] sm:$0xff] }
  0xac   : > { %3980 = vst [vmem:[#allocation58_spill] sm:$0xff] %v2980_v11  ;;  %3981 = vst [vmem:[#allocation59_spill] sm:$0xff] %v2982_v16  ;;  %v436_v16 = vand.u32 4294901760, %v328_v19  ;;  %v330_v11 = vld [vmem:[#allocation9 + $0x160] sm:$0xff]  ;;  %v3002_v7 = vsub.f32 %v323_v0, %v422_v32  ;;  %v442_v51 = vand.u32 4294901760, %v333_v48  ;;  %v3006_v18 = vpack.c.bf16 %v428_v17, %v424_v42 }
  0xad   : > { %3982 = vst [vmem:[#allocation60_spill] sm:$0xff] %v2984_v15  ;;  %3983 = vst [vmem:[#allocation61_spill] sm:$0xff] %v2986_v33  ;;  %v432_v33 = vand.u32 4294901760, %v326_v20  ;;  %v3008_v4 = vsub.f32 %v322_v22, %v424_v42  ;;  %v3010_v13 = vsub.f32 %v324_v5, %v428_v17  ;;  %v334_v57 = vld [vmem:[#allocation9 + $0x180] sm:$0xff]  ;;  %v3014_v55 = vpack.c.bf16 %v434_v50, %v430_v49 }
  0xae   : > { %3984 = vst [vmem:[#allocation62_spill] sm:$0xff] %v2990_v24  ;;  %3985 = vst [vmem:[#allocation63_spill] sm:$0xff] %v2992_v25  ;;  %v337_v25 = vld [vmem:[#allocation9 + $0x198] sm:$0xff]  ;;  %v3004_v24 = vsub.f32 %v325_v53, %v426_v31  ;;  %1959 = vmatpush1.bf16.msra.mxu1 %v2962_v2  ;;  %2151 = vmatpush1.bf16.msra.mxu0 %v2962_v2  ;;  %v3016_v0 = vsub.f32 %v327_v10, %v430_v49  ;;  %v440_v32 = vand.u32 4294901760, %v330_v11  ;;  %v339_v31 = vld [vmem:[#allocation9 + $0x1a8] sm:$0xff] }
  0xaf   : > { %3986 = vst [vmem:[#allocation64_spill] sm:$0xff] %v2996_v36  ;;  %3987 = vst [vmem:[#allocation65_spill] sm:$0xff] %v2998_v9  ;;  %v336_v9 = vld [vmem:[#allocation9 + $0x190] sm:$0xff]  ;;  %v341_v53 = vld [vmem:[#allocation9 + $0x1b8] sm:$0xff]  ;;  %1961 = vmatprep.subr.bf16.mxu1 %v2974_v23  ;;  %2153 = vmatprep.subr.bf16.mxu0 %v2974_v23  ;;  %v3020_v22 = vsub.f32 %v329_v29, %v434_v50  ;;  %v3022_v5 = vpack.c.bf16 %v436_v16, %v432_v33  ;;  %v446_v42 = vand.u32 4294901760, %v335_v52 }
  0xb0   : > { %3988 = vst [vmem:[#allocation66_spill] sm:$0xff] %v3000_v3  ;;  %3989 = vst [vmem:[#allocation67_spill] sm:$0xff] %v3002_v7  ;;  %v444_v7 = vand.u32 4294901760, %v332_v21  ;;  %v450_v17 = vand.u32 4294901760, %v337_v25  ;;  %v3024_v2 = vsub.f32 %v326_v20, %v432_v33  ;;  %v3028_v10 = vpack.c.bf16 %v442_v51, %v438_v41  ;;  %v343_v29 = vld [vmem:[#allocation9 + $0x1c8] sm:$0xff]  ;;  %v345_v50 = vld [vmem:[#allocation9 + $0x1d8] sm:$0xff] }
  0xb1   : > { %3990 = vst [vmem:[#allocation68_spill] sm:$0xff] %v3004_v24  ;;  %3991 = vst [vmem:[#allocation69_spill] sm:$0xff] %v3006_v18  ;;  %v3030_v49 = vsub.f32 %v331_v43, %v438_v41  ;;  %v448_v24 = vand.u32 4294901760, %v334_v57  ;;  %v452_v62 = vand.u32 4294901760, %v336_v9  ;;  %v454_v56 = vand.u32 4294901760, %v339_v31 }
  0xb2   : > { %3992 = vst [vmem:[#allocation70_spill] sm:$0xff] %v3008_v4  ;;  %3993 = vst [vmem:[#allocation71_spill] sm:$0xff] %v3010_v13  ;;  %v3026_v13 = vsub.f32 %v328_v19, %v436_v16  ;;  %v340_v4 = vld [vmem:[#allocation9 + $0x1b0] sm:$0xff]  ;;  %v458_v23 = vand.u32 4294901760, %v341_v53  ;;  %1963 = vmatpush1.bf16.msra.mxu1 %v2978_v40  ;;  %2155 = vmatpush1.bf16.msra.mxu0 %v2978_v40  ;;  %v3034_v20 = vsub.f32 %v333_v48, %v442_v51 }
  0xb3   : > { %3994 = vst [vmem:[#allocation72_spill] sm:$0xff] %v3014_v55  ;;  %3995 = vst [vmem:[#allocation73_spill] sm:$0xff] %v3016_v0  ;;  %v338_v0 = vld [vmem:[#allocation9 + $0x1a0] sm:$0xff]  ;;  %v3036_v19 = vpack.c.bf16 %v444_v7, %v440_v32  ;;  %v3038_v33 = vsub.f32 %v330_v11, %v440_v32  ;;  %1965 = vmatprep.subr.bf16.mxu1 %v2984_v15  ;;  %2157 = vmatprep.subr.bf16.mxu0 %v2984_v15  ;;  %v462_v11 = vand.u32 4294901760, %v343_v29 }
  0xb4   : > { %3996 = vst [vmem:[#allocation74_spill] sm:$0xff] %v3020_v22  ;;  %3997 = vst [vmem:[#allocation75_spill] sm:$0xff] %v3022_v5  ;;  %v3042_v16 = vsub.f32 %v332_v21, %v444_v7  ;;  %v3044_v43 = vpack.c.bf16 %v450_v17, %v446_v42  ;;  %v456_v41 = vand.u32 4294901760, %v338_v0  ;;  %v3046_v40 = vsub.f32 %v335_v52, %v446_v42  ;;  %v347_v7 = vld [vmem:[#allocation9 + $0x1e8] sm:$0xff] }
  0xb5   : > { %3998 = vst [vmem:[#allocation76_spill] sm:$0xff] %v3024_v2  ;;  %3999 = vst [vmem:[#allocation77_spill] sm:$0xff] %v3026_v13  ;;  %v342_v13 = vld [vmem:[#allocation9 + $0x1c0] sm:$0xff]  ;;  %v344_v2 = vld [vmem:[#allocation9 + $0x1d0] sm:$0xff]  ;;  %v3048_v48 = vsub.f32 %v337_v25, %v450_v17  ;;  %v466_v51 = vand.u32 4294901760, %v345_v50  ;;  %v3050_v32 = vpack.c.bf16 %v452_v62, %v448_v24  ;;  %v3054_v15 = vsub.f32 %v336_v9, %v452_v62 }
  0xb6   : > { %4000 = vst [vmem:[#allocation78_spill] sm:$0xff] %v3028_v10  ;;  %4001 = vst [vmem:[#allocation79_spill] sm:$0xff] %v3030_v49  ;;  %v460_v49 = vand.u32 4294901760, %v340_v4  ;;  %v3056_v21 = vpack.c.bf16 %v458_v23, %v454_v56  ;;  %1967 = vmatpush1.bf16.msra.mxu1 %v2996_v36  ;;  %2159 = vmatpush1.bf16.msra.mxu0 %v2996_v36  ;;  %v3061_v52 = vsub.f32 %v339_v31, %v454_v56 }
  0xb7   : > { %4002 = vst [vmem:[#allocation80_spill] sm:$0xff] %v3034_v20  ;;  %4003 = vst [vmem:[#allocation81_spill] sm:$0xff] %v3036_v19  ;;  %v3063_v25 = vsub.f32 %v341_v53, %v458_v23  ;;  %v464_v42 = vand.u32 4294901760, %v342_v13  ;;  %v468_v17 = vand.u32 4294901760, %v344_v2  ;;  %1969 = vmatprep.subr.bf16.mxu1 %v3000_v3  ;;  %2161 = vmatprep.subr.bf16.mxu0 %v3000_v3  ;;  %v470_v23 = vand.u32 4294901760, %v347_v7 }
  0xb8   : > { %4004 = vst [vmem:[#allocation82_spill] sm:$0xff] %v3038_v33  ;;  %4005 = vst [vmem:[#allocation83_spill] sm:$0xff] %v3042_v16  ;;  %v3052_v33 = vsub.f32 %v334_v57, %v448_v24  ;;  %v283_v16 = vld [vmem:[%s2848_s9 + $0x8] sm:$0xff]  ;;  %v3068_v62 = vpack.c.bf16 %v460_v49, %v456_v41  ;;  %v3070_v24 = vsub.f32 %v338_v0, %v456_v41  ;;  %v349_v57 = vld [vmem:[#allocation9 + $0x1f8] sm:$0xff]  ;;  %v513_v36 = vand.u32 4294901760, %v2874_v26 }
  0xb9   : > { %4006 = vst [vmem:[#allocation84_spill] sm:$0xff] %v3044_v43  ;;  %4007 = vst [vmem:[#allocation85_spill] sm:$0xff] %v3046_v40  ;;  %v3072_v9 = vsub.f32 %v340_v4, %v460_v49  ;;  %v3076_v56 = vsub.f32 %v343_v29, %v462_v11  ;;  %v3078_v31 = vand.u32 4294901760, %v283_v16  ;;  %v3080_v53 = vsub.f32 %v345_v50, %v466_v51  ;;  %v346_v49 = vld [vmem:[#allocation9 + $0x1e0] sm:$0xff]  ;;  %v348_v29 = vld [vmem:[#allocation9 + $0x1f0] sm:$0xff] }
  0xba   : > { %4008 = vst [vmem:[#allocation86_spill] sm:$0xff] %v3048_v48  ;;  %4009 = vst [vmem:[#allocation87_spill] sm:$0xff] %v3050_v32  ;;  %v282_v48 = vld [vmem:[%s2848_s9] sm:$0xff]  ;;  %v525_v3 = vand.u32 4294901760, %v2878_v30  ;;  %1971 = vmatpush1.bf16.msra.mxu1 %v3006_v18  ;;  %2163 = vmatpush1.bf16.msra.mxu0 %v3006_v18  ;;  %v3088_v4 = vpack.c.bf16 %v468_v17, %v464_v42  ;;  %v474_v0 = vand.u32 4294901760, %v349_v57  ;;  %v519_v50 = vand.u32 4294901760, %v2884_v37 }
  0xbb   : > { %4010 = vst [vmem:[#allocation88_spill] sm:$0xff] %v3052_v33  ;;  %4011 = vst [vmem:[#allocation89_spill] sm:$0xff] %v3054_v15  ;;  %v3074_v15 = vpack.c.bf16 %v466_v51, %v462_v11  ;;  %v3091_v41 = vsub.f32 %v283_v16, %v3078_v31  ;;  %1973 = vmatprep.subr.bf16.mxu1 %v3014_v55  ;;  %2165 = vmatprep.subr.bf16.mxu0 %v3014_v55  ;;  %v531_v18 = vand.u32 4294901760, %v2886_v38 }
  0xbc   : > { %4012 = vst [vmem:[#allocation90_spill] sm:$0xff] %v3056_v21  ;;  %4013 = vst [vmem:[#allocation91_spill] sm:$0xff] %v3061_v52  ;;  %v3096_v11 = vsub.f32 %v342_v13, %v464_v42  ;;  %v3098_v51 = vsub.f32 %v344_v2, %v468_v17  ;;  %v526_v16 = vsub.f32 %v2878_v30, %v525_v3  ;;  %v476_v52 = vand.u32 4294901760, %v348_v29 }
  0xbd   : > { %4014 = vst [vmem:[#allocation92_spill] sm:$0xff] %v3063_v25  ;;  %4015 = vst [vmem:[#allocation93_spill] sm:$0xff] %v3068_v62  ;;  %v3084_v25 = vand.u32 4294901760, %v282_v48  ;;  %v520_v13 = vsub.f32 %v2884_v37, %v519_v50  ;;  %v537_v2 = vand.u32 4294901760, %v2888_v39  ;;  %v532_v55 = vsub.f32 %v2886_v38, %v531_v18 }
  0xbe   : > { %4016 = vst [vmem:[#allocation94_spill] sm:$0xff] %v3070_v24  ;;  %4017 = vst [vmem:[#allocation95_spill] sm:$0xff] %v3072_v9  ;;  %v514_v9 = vsub.f32 %v2874_v26, %v513_v36  ;;  %v472_v24 = vand.u32 4294901760, %v346_v49  ;;  %1975 = vmatpush1.bf16.msra.mxu1 %v3022_v5  ;;  %2167 = vmatpush1.bf16.msra.mxu0 %v3022_v5  ;;  %v549_v37 = vand.u32 4294901760, %v2892_v44  ;;  %v543_v5 = vand.u32 4294901760, %v2894_v45 }
  0xbf   : > { %4018 = vst [vmem:[#allocation96_spill] sm:$0xff] %v3074_v15  ;;  %4019 = vst [vmem:[#allocation97_spill] sm:$0xff] %v3076_v56  ;;  %v480_v56 = vand.u32 4294901760, %v3091_v41  ;;  %1977 = vmatprep.subr.bf16.mxu1 %v3028_v10  ;;  %2169 = vmatprep.subr.bf16.mxu0 %v3028_v10  ;;  %v527_v26 = vand.u32 4294901760, %v526_v16  ;;  %v555_v17 = vand.u32 4294901760, %v2896_v46  ;;  %v3129_v38 = vsub.f32 %v348_v29, %v476_v52 }
  0xc0   : > { %4020 = vst [vmem:[#allocation98_spill] sm:$0xff] %v3078_v31  ;;  %4021 = vst [vmem:[#allocation99_spill] sm:$0xff] %v3080_v53  ;;  %v3100_v53 = vsub.f32 %v347_v7, %v470_v23  ;;  %v3107_v31 = vsub.f32 %v282_v48, %v3084_v25  ;;  %v3113_v7 = vpack.c.bf16 %v474_v0, %v470_v23  ;;  %v515_v30 = vand.u32 4294901760, %v514_v9 }
  0xc1   : > { %4022 = vst [vmem:[#allocation100_spill] sm:$0xff] %v3084_v25  ;;  %4023 = vst [vmem:[#allocation101_spill] sm:$0xff] %v3088_v4  ;;  %v481_v42 = vsub.f32 %v3091_v41, %v480_v56  ;;  %v3120_v48 = vsub.f32 %v349_v57, %v474_v0  ;;  %v3122_v25 = vsub.f32 %v346_v49, %v472_v24  ;;  %1256 = vmatprep.mubr.f32.mxu0 %v480_v56 }
  0xc2   : > { %4024 = vst [vmem:[#allocation102_spill] sm:$0xff] %v3091_v41  ;;  %4025 = vst [vmem:[#allocation103_spill] sm:$0xff] %v3100_v53  ;;  %v3127_v41 = vpack.c.bf16 %v476_v52, %v472_v24  ;;  %v521_v53 = vand.u32 4294901760, %v520_v13  ;;  %v538_v57 = vsub.f32 %v2888_v39, %v537_v2  ;;  %1979 = vmatpush1.bf16.msra.mxu1 %v3036_v19  ;;  %2171 = vmatpush1.bf16.msra.mxu0 %v3036_v19 }
  0xc3   : > { %4026 = vst [vmem:[#allocation104_spill] sm:$0xff] %v3107_v31  ;;  %4027 = vst [vmem:[#allocation105_spill] sm:$0xff] %v3113_v7  ;;  %v482_v23 = vand.u32 4294901760, %v481_v42  ;;  %v4029_v0 = vand.u32 4294901760, %v3107_v31  ;;  %v533_v9 = vand.u32 4294901760, %v532_v55  ;;  %v550_v56 = vsub.f32 %v2892_v44, %v549_v37  ;;  %1981 = vmatprep.subr.bf16.mxu1 %v3044_v43  ;;  %2173 = vmatprep.subr.bf16.mxu0 %v3044_v43 }
  0xc4   : > { %4028 = vst [vmem:[#allocation106_spill] sm:$0xff] %v3127_v41  ;;  %v561_v24 = vand.u32 4294901760, %v2898_v47  ;;  %v3143_v52 = vpack.c.bf16 %v525_v3, %v513_v36  ;;  %v544_v29 = vsub.f32 %v2894_v45, %v543_v5  ;;  %v573_v16 = vand.u32 4294901760, %v2908_v58 }
  0xc5   : > { %v3137_v49 = vsub.f32 %v3107_v31, %v4029_v0  ;;  %v567_v13 = vand.u32 4294901760, %v2910_v59  ;;  %483 = vmatprep.mubr.f32.mxu1 %v482_v23  ;;  %v3148_v42 = vpack.c.bf16 %v527_v26, %v515_v30  ;;  %v3150_v55 = vpack.c.bf16 %v531_v18, %v519_v50 }
  0xc6   : > { %v556_v0 = vsub.f32 %v2896_v46, %v555_v17  ;;  %v579_v19 = vand.u32 4294901760, %v2912_v60  ;;  %v539_v10 = vand.u32 4294901760, %v538_v57  ;;  %v562_v43 = vsub.f32 %v2898_v47, %v561_v24  ;;  %1983 = vmatpush1.bf16.msra.mxu1 %v3050_v32  ;;  %2175 = vmatpush1.bf16.msra.mxu0 %v3050_v32 }
  0xc7   : > { %v574_v3 = vsub.f32 %v2908_v58, %v573_v16  ;;  %v585_v36 = vand.u32 4294901760, %v2914_v61  ;;  %v3160_v30 = vpack.c.bf16 %v533_v9, %v521_v53  ;;  %v551_v18 = vand.u32 4294901760, %v550_v56  ;;  %1985 = vmatprep.subr.bf16.mxu1 %v3056_v21  ;;  %2177 = vmatprep.subr.bf16.mxu0 %v3056_v21 }
  0xc8   : > { %v3162_v50 = vpack.c.bf16 %v549_v37, %v537_v2  ;;  %v545_v23 = vand.u32 4294901760, %v544_v29  ;;  %v568_v57 = vsub.f32 %v2910_v59, %v567_v13  ;;  %v580_v44 = vsub.f32 %v2912_v60, %v579_v19 }
  0xc9   : > { %v597_v39 = vand.u32 4294901760, %v2916_v63  ;;  %v557_v58 = vand.u32 4294901760, %v556_v0  ;;  %v591_v32 = vand.u32 4294901760, %v2920_v1  ;;  %v603_v53 = vand.u32 4294901760, %v2924_v6 }
  0xca   : > { %v609_v9 = vand.u32 4294901760, %v2928_v8  ;;  %v3172_v37 = vpack.c.bf16 %v555_v17, %v543_v5  ;;  %v563_v2 = vand.u32 4294901760, %v562_v43  ;;  %v575_v56 = vand.u32 4294901760, %v574_v3  ;;  %1987 = vmatpush1.bf16.msra.mxu1 %v3068_v62  ;;  %2179 = vmatpush1.bf16.msra.mxu0 %v3068_v62 }
  0xcb   : > { %v586_v26 = vsub.f32 %v2914_v61, %v585_v36  ;;  %v3177_v29 = vpack.c.bf16 %v551_v18, %v539_v10  ;;  %v3179_v21 = vpack.c.bf16 %v573_v16, %v561_v24  ;;  %v598_v0 = vsub.f32 %v2916_v63, %v597_v39  ;;  %1989 = vmatprep.subr.bf16.mxu1 %v3074_v15 }
  0xcc   : > { %v621_v60 = vand.u32 4294901760, %v2932_v12  ;;  %2181 = vmatprep.subr.bf16.mxu0 %v3074_v15  ;;  %v569_v5 = vand.u32 4294901760, %v568_v57  ;;  %v581_v43 = vand.u32 4294901760, %v580_v44  ;;  %v592_v17 = vsub.f32 %v2920_v1, %v591_v32 }
  0xcd   : > { %v604_v3 = vsub.f32 %v2924_v6, %v603_v53  ;;  %v3187_v61 = vpack.c.bf16 %v557_v58, %v545_v23  ;;  %v3189_v10 = vpack.c.bf16 %v579_v19, %v567_v13  ;;  %v610_v24 = vsub.f32 %v2928_v8, %v609_v9 }
  0xce   : > { %v615_v16 = vand.u32 4294901760, %v2936_v14  ;;  %v3193_v18 = vpack.c.bf16 %v575_v56, %v563_v2  ;;  %v587_v62 = vand.u32 4294901760, %v586_v26  ;;  %v622_v63 = vsub.f32 %v2932_v12, %v621_v60  ;;  %1991 = vmatpush1.bf16.msra.mxu1 %v3088_v4  ;;  %2183 = vmatpush1.bf16.msra.mxu0 %v3088_v4 }
  0xcf   : > { %v627_v57 = vand.u32 4294901760, %v2938_v27  ;;  %v599_v44 = vand.u32 4294901760, %v598_v0  ;;  %v3199_v58 = vpack.c.bf16 %v597_v39, %v585_v36  ;;  %v633_v19 = vand.u32 4294901760, %v2940_v28  ;;  %1993 = vmatprep.subr.bf16.mxu1 %v3113_v7  ;;  %2185 = vmatprep.subr.bf16.mxu0 %v3113_v7 }
  0xd0   : > { %v645_v13 = vand.u32 4294901760, %v2946_v34  ;;  %v3205_v26 = vpack.c.bf16 %v581_v43, %v569_v5  ;;  %v593_v23 = vand.u32 4294901760, %v592_v17  ;;  %v605_v2 = vand.u32 4294901760, %v604_v3  ;;  %v4031_v17 = vld [vmem:[#allocation50_spill] sm:$0xff] }
  0xd1   : > { %v639_v56 = vand.u32 4294901760, %v2948_v35  ;;  %v3208_v15 = vpack.c.bf16 %v603_v53, %v591_v32  ;;  %v611_v4 = vand.u32 4294901760, %v610_v24  ;;  %v616_v39 = vsub.f32 %v2936_v14, %v615_v16  ;;  %v4030_v32 = vld [vmem:[#allocation49_spill] sm:$0xff]  ;;  %v4047_v14 = vld [vmem:[#allocation71_spill] sm:$0xff] }
  0xd2   : > { %v628_v36 = vsub.f32 %v2938_v27, %v627_v57  ;;  %v623_v0 = vand.u32 4294901760, %v622_v63  ;;  %v634_v12 = vsub.f32 %v2940_v28, %v633_v19  ;;  %v646_v8 = vsub.f32 %v2946_v34, %v645_v13  ;;  %1995 = vmatpush1.bf16.msra.mxu1 %v3127_v41  ;;  %2187 = vmatpush1.bf16.msra.mxu0 %v3127_v41 }
  0xd3   : > { %v651_v7 = vand.u32 4294901760, %v2954_v54  ;;  %v2008_v5 = vpack.c.bf16 %v599_v44, %v587_v62  ;;  %v3217_v43 = vpack.c.bf16 %v621_v60, %v609_v9  ;;  %v657_v53 = vand.u32 4294901760, %v4030_v32  ;;  %1997 = vmatprep.subr.bf16.mxu1 %v3148_v42  ;;  %2189 = vmatprep.subr.bf16.mxu0 %v3143_v52  ;;  %v4032_v60 = vld [vmem:[#allocation52_spill] sm:$0xff] }
  0xd4   : > { %v669_v3 = vand.u32 4294901760, %v4031_v17  ;;  %v3223_v63 = vpack.c.bf16 %v605_v2, %v593_v23  ;;  %v640_v24 = vsub.f32 %v2948_v35, %v639_v56  ;;  %v617_v28 = vand.u32 4294901760, %v616_v39  ;;  %v4035_v2 = vld [vmem:[#allocation53_spill] sm:$0xff] }
  0xd5   : > { %v652_v34 = vsub.f32 %v2954_v54, %v651_v7  ;;  %v629_v27 = vand.u32 4294901760, %v628_v36  ;;  %v3227_v41 = vpack.c.bf16 %v627_v57, %v615_v16  ;;  %v663_v62 = vand.u32 4294901760, %v4032_v60  ;;  %v4037_v36 = vld [vmem:[#allocation56_spill] sm:$0xff] }
  0xd6   : > { %v4033_v9 = vand.u32 4294901760, %v3137_v49  ;;  %v4034_v44 = vand.u32 4294901760, %v3107_v31  ;;  %v3234_v42 = vpack.c.bf16 %v623_v0, %v611_v4  ;;  %v635_v52 = vand.u32 4294901760, %v634_v12  ;;  %v4036_v12 = vld [vmem:[#allocation54_spill] sm:$0xff] }
  0xd7   : > { %v647_v23 = vand.u32 4294901760, %v646_v8  ;;  %v675_v35 = vand.u32 4294901760, %v4035_v2  ;;  %v3239_v16 = vpack.c.bf16 %v645_v13, %v633_v19  ;;  %v658_v57 = vsub.f32 %v4030_v32, %v657_v53  ;;  %v4038_v19 = vld [vmem:[#allocation58_spill] sm:$0xff]  ;;  %v4043_v32 = vld [vmem:[#allocation65_spill] sm:$0xff] }
  0xd8   : > { %489 = vmatmul.mubr.f32.vlgmr.msra.gmra.mrb[0].mxu1 %v4033_v9  ;;  %1260 = vmatmul.mubr.f32.vlgmr.msra.gmra.mrb[0].mxu0 %v4034_v44  ;;  %v670_v49 = vsub.f32 %v4031_v17, %v669_v3  ;;  %v641_v4 = vand.u32 4294901760, %v640_v24  ;;  %v653_v39 = vand.u32 4294901760, %v652_v34  ;;  %v681_v8 = vand.u32 4294901760, %v4036_v12  ;;  %v4040_v24 = vld [vmem:[#allocation61_spill] sm:$0xff] }
  0xd9   : > { %1999 = vmatpush1.bf16.msra.mxu1 %v3160_v30  ;;  %2191 = vmatpush1.bf16.msra.mxu0 %v3150_v55  ;;  %v693_v0 = vand.u32 4294901760, %v4037_v36  ;;  %v3247_v9 = vpack.c.bf16 %v629_v27, %v617_v28  ;;  %v664_v55 = vsub.f32 %v4032_v60, %v663_v62  ;;  %v676_v30 = vsub.f32 %v4035_v2, %v675_v35  ;;  %v4041_v60 = vld [vmem:[#allocation62_spill] sm:$0xff] }
  0xda   : > { %2001 = vmatprep.subr.bf16.mxu1 %v3177_v29  ;;  %2193 = vmatprep.subr.bf16.mxu0 %v3162_v50  ;;  %v687_v13 = vand.u32 4294901760, %v4038_v19  ;;  %v3252_v44 = vpack.c.bf16 %v647_v23, %v635_v52  ;;  %v3254_v31 = vpack.c.bf16 %v651_v7, %v639_v56  ;;  %v4039_v29 = vld [vmem:[#allocation59_spill] sm:$0xff]  ;;  %v705_v34 = vand.u32 4294901760, %v4040_v24 }
  0xdb   : > { %v699_v50 = vand.u32 4294901760, %v4039_v29  ;;  %v659_v27 = vand.u32 4294901760, %v658_v57  ;;  %v671_v28 = vand.u32 4294901760, %v670_v49  ;;  %v3260_v17 = vpack.c.bf16 %v669_v3, %v657_v53  ;;  %v4042_v57 = vld [vmem:[#allocation63_spill] sm:$0xff] }
  0xdc   : > { %v717_v2 = vand.u32 4294901760, %v4041_v60  ;;  %v3265_v7 = vpack.c.bf16 %v653_v39, %v641_v4  ;;  %v682_v56 = vsub.f32 %v4036_v12, %v681_v8  ;;  %v694_v52 = vsub.f32 %v4037_v36, %v693_v0 }
  0xdd   : > { %2003 = vmatpush1.bf16.msra.mxu1 %v3187_v61  ;;  %2195 = vmatpush1.bf16.msra.mxu0 %v3172_v37  ;;  %v665_v23 = vand.u32 4294901760, %v664_v55  ;;  %v677_v61 = vand.u32 4294901760, %v676_v30  ;;  %v688_v37 = vsub.f32 %v4038_v19, %v687_v13  ;;  %v711_v49 = vand.u32 4294901760, %v4042_v57  ;;  %v4044_v55 = vld [vmem:[#allocation67_spill] sm:$0xff]  ;;  %v4045_v19 = vld [vmem:[#allocation68_spill] sm:$0xff] }
  0xde   : > { %2005 = vmatprep.subr.bf16.mxu1 %v3193_v18  ;;  %2197 = vmatprep.subr.bf16.mxu0 %v3179_v21  ;;  %v3271_v53 = vpack.c.bf16 %v675_v35, %v663_v62  ;;  %v700_v3 = vsub.f32 %v4039_v29, %v699_v50  ;;  %v706_v18 = vsub.f32 %v4040_v24, %v705_v34  ;;  %v723_v21 = vand.u32 4294901760, %v4043_v32  ;;  %v4046_v29 = vld [vmem:[#allocation70_spill] sm:$0xff] }
  0xdf   : > { %v3278_v4 = vpack.c.bf16 %v671_v28, %v659_v27  ;;  %v718_v39 = vsub.f32 %v4041_v60, %v717_v2  ;;  %v729_v30 = vand.u32 4294901760, %v4044_v55  ;;  %v741_v36 = vand.u32 4294901760, %v4045_v19 }
  0xe0   : > { %v683_v35 = vand.u32 4294901760, %v682_v56  ;;  %v695_v62 = vand.u32 4294901760, %v694_v52  ;;  %v3284_v24 = vpack.c.bf16 %v693_v0, %v681_v8  ;;  %v735_v12 = vand.u32 4294901760, %v4046_v29 }
  0xe1   : > { %2007 = vmatpush1.bf16.msra.mxu1 %v3205_v26  ;;  %2199 = vmatpush1.bf16.msra.mxu0 %v3189_v10  ;;  %v3287_v26 = vpack.c.bf16 %v677_v61, %v665_v23  ;;  %v689_v10 = vand.u32 4294901760, %v688_v37  ;;  %v712_v27 = vsub.f32 %v4042_v57, %v711_v49  ;;  %v724_v28 = vsub.f32 %v4043_v32, %v723_v21  ;;  %v4050_v32 = vld [vmem:[#allocation77_spill] sm:$0xff] }
  0xe2   : > { %2009 = vmatprep.subr.bf16.mxu1 %v2008_v5  ;;  %2201 = vmatprep.subr.bf16.mxu0 %v3199_v58  ;;  %v701_v60 = vand.u32 4294901760, %v700_v3  ;;  %v707_v54 = vand.u32 4294901760, %v706_v18  ;;  %v747_v6 = vand.u32 4294901760, %v4047_v14  ;;  %v4048_v5 = vld [vmem:[#allocation73_spill] sm:$0xff]  ;;  %v719_v58 = vand.u32 4294901760, %v718_v39 }
  0xe3   : > { %v753_v1 = vand.u32 4294901760, %v4048_v5  ;;  %v730_v8 = vsub.f32 %v4044_v55, %v729_v30  ;;  %v742_v0 = vsub.f32 %v4045_v19, %v741_v36  ;;  %v765_v56 = vand.u32 4294901760, %v3020_v22  ;;  %v4100_v57 = vld [vmem:[#allocation85_spill] sm:$0xff] }
  0xe4   : > { %v3300_v52 = vpack.c.bf16 %v699_v50, %v687_v13  ;;  %v736_v23 = vsub.f32 %v4046_v29, %v735_v12  ;;  %v748_v61 = vsub.f32 %v4047_v14, %v747_v6  ;;  %v3305_v3 = vpack.c.bf16 %v717_v2, %v705_v34 }
  0xe5   : > { %2011 = vmatpush1.bf16.msra.mxu1 %v3223_v63  ;;  %2203 = vmatpush1.bf16.msra.mxu0 %v3208_v15  ;;  %v4049_v63 = vld [vmem:[#allocation76_spill] sm:$0xff]  ;;  %v2024_v15 = vpack.c.bf16 %v695_v62, %v683_v35  ;;  %v713_v18 = vand.u32 4294901760, %v712_v27  ;;  %v725_v39 = vand.u32 4294901760, %v724_v28  ;;  %v2026_v19 = vpack.c.bf16 %v701_v60, %v689_v10 }
  0xe6   : > { %2013 = vmatprep.subr.bf16.mxu1 %v3234_v42  ;;  %2205 = vmatprep.subr.bf16.mxu0 %v3217_v43  ;;  %v759_v37 = vand.u32 4294901760, %v4049_v63  ;;  %v754_v55 = vsub.f32 %v4048_v5, %v753_v1  ;;  %v766_v42 = vsub.f32 %v3020_v22, %v765_v56  ;;  %v771_v43 = vand.u32 4294901760, %v4050_v32  ;;  %v4103_v5 = vld [vmem:[#allocation89_spill] sm:$0xff] }
  0xe7   : > { %v3312_v13 = vpack.c.bf16 %v719_v58, %v707_v54  ;;  %v3314_v50 = vpack.c.bf16 %v723_v21, %v711_v49  ;;  %v731_v35 = vand.u32 4294901760, %v730_v8  ;;  %v743_v2 = vand.u32 4294901760, %v742_v0  ;;  %v4051_v54 = vld [vmem:[#allocation79_spill] sm:$0xff]  ;;  %v4052_v58 = vld [vmem:[#allocation82_spill] sm:$0xff] }
  0xe8   : > { %v3318_v60 = vpack.c.bf16 %v741_v36, %v729_v30  ;;  %v737_v34 = vand.u32 4294901760, %v736_v23  ;;  %v749_v62 = vand.u32 4294901760, %v748_v61  ;;  %v760_v10 = vsub.f32 %v4049_v63, %v759_v37  ;;  %v4053_v8 = vld [vmem:[#allocation83_spill] sm:$0xff]  ;;  %v4054_v23 = vld [vmem:[#allocation86_spill] sm:$0xff] }
  0xe9   : > { %2015 = vmatpush1.bf16.msra.mxu1 %v3247_v9  ;;  %2207 = vmatpush1.bf16.msra.mxu0 %v3227_v41  ;;  %v3321_v27 = vpack.c.bf16 %v725_v39, %v713_v18  ;;  %v772_v41 = vsub.f32 %v4050_v32, %v771_v43  ;;  %v777_v9 = vand.u32 4294901760, %v4051_v54  ;;  %v789_v49 = vand.u32 4294901760, %v3034_v20  ;;  %v4061_v32 = vld [vmem:[#allocation99_spill] sm:$0xff] }
  0xea   : > { %2017 = vmatprep.subr.bf16.mxu1 %v3252_v44  ;;  %2209 = vmatprep.subr.bf16.mxu0 %v3239_v16  ;;  %v755_v21 = vand.u32 4294901760, %v754_v55  ;;  %v767_v28 = vand.u32 4294901760, %v766_v42  ;;  %v783_v44 = vand.u32 4294901760, %v4052_v58  ;;  %v795_v16 = vand.u32 4294901760, %v4053_v8 }
  0xeb   : > { %v3330_v36 = vpack.c.bf16 %v743_v2, %v731_v35  ;;  %v3332_v30 = vpack.c.bf16 %v747_v6, %v735_v12  ;;  %v801_v0 = vand.u32 4294901760, %v3046_v40  ;;  %v813_v61 = vand.u32 4294901760, %v4054_v23  ;;  %v4055_v2 = vld [vmem:[#allocation89_spill] sm:$0xff] }
  0xec   : > { %v3338_v55 = vpack.c.bf16 %v749_v62, %v737_v34  ;;  %v3340_v18 = vpack.c.bf16 %v765_v56, %v753_v1  ;;  %v761_v39 = vand.u32 4294901760, %v760_v10  ;;  %v3343_v42 = vpack.c.bf16 %v771_v43, %v759_v37  ;;  %v4056_v10 = vld [vmem:[#allocation91_spill] sm:$0xff] }
  0xed   : > { %2019 = vmatpush1.bf16.msra.mxu1 %v3265_v7  ;;  %2211 = vmatpush1.bf16.msra.mxu0 %v3254_v31  ;;  %v807_v7 = vand.u32 4294901760, %v3052_v33  ;;  %v773_v31 = vand.u32 4294901760, %v772_v41  ;;  %v778_v6 = vsub.f32 %v4051_v54, %v777_v9  ;;  %v790_v12 = vsub.f32 %v3034_v20, %v789_v49 }
  0xee   : > { %2021 = vmatprep.subr.bf16.mxu1 %v3278_v4  ;;  %2213 = vmatprep.subr.bf16.mxu0 %v3260_v17  ;;  %v3347_v35 = vpack.c.bf16 %v767_v28, %v755_v21  ;;  %v784_v4 = vsub.f32 %v4052_v58, %v783_v44  ;;  %v796_v17 = vsub.f32 %v4053_v8, %v795_v16  ;;  %v819_v34 = vand.u32 4294901760, %v4055_v2  ;;  %v4057_v21 = vld [vmem:[#allocation92_spill] sm:$0xff] }
  0xef   : > { %v3354_v1 = vpack.c.bf16 %v789_v49, %v777_v9  ;;  %v802_v56 = vsub.f32 %v3046_v40, %v801_v0  ;;  %v814_v37 = vsub.f32 %v4054_v23, %v813_v61  ;;  %v808_v43 = vsub.f32 %v3052_v33, %v807_v7  ;;  %v4058_v49 = vld [vmem:[#allocation94_spill] sm:$0xff] }
  0xf0   : > { %v820_v62 = vsub.f32 %v4055_v2, %v819_v34  ;;  %v825_v41 = vand.u32 4294901760, %v4056_v10  ;;  %v3363_v28 = vpack.c.bf16 %v773_v31, %v761_v39  ;;  %v791_v9 = vand.u32 4294901760, %v790_v12  ;;  %v3373_v31 = vld [vmem:[%s2848_s9 + $0x18] sm:$0xff] }
  0xf1   : > { %2023 = vmatpush1.bf16.msra.mxu1 %v3287_v26  ;;  %2215 = vmatpush1.bf16.msra.mxu0 %v3271_v53  ;;  %v837_v26 = vand.u32 4294901760, %v4057_v21  ;;  %v779_v53 = vand.u32 4294901760, %v778_v6  ;;  %v831_v40 = vand.u32 4294901760, %v4058_v49  ;;  %v785_v8 = vand.u32 4294901760, %v784_v4  ;;  %4062 = vst [vmem:[#allocation70_spill] sm:$0xff] %v3373_v31 }
  0xf2   : > { %2025 = vmatprep.subr.bf16.mxu1 %v2024_v15  ;;  %2217 = vmatprep.subr.bf16.mxu0 %v3284_v24  ;;  %v797_v23 = vand.u32 4294901760, %v796_v17  ;;  %v4059_v15 = vld [vmem:[#allocation95_spill] sm:$0xff]  ;;  %v4060_v24 = vld [vmem:[#allocation97_spill] sm:$0xff]  ;;  %v3369_v2 = vpack.c.bf16 %v795_v16, %v783_v44  ;;  %v803_v33 = vand.u32 4294901760, %v802_v56  ;;  %v815_v54 = vand.u32 4294901760, %v814_v37 }
  0xf3   : > { %v843_v58 = vand.u32 4294901760, %v4059_v15  ;;  %v849_v20 = vand.u32 4294901760, %v4060_v24  ;;  %v861_v39 = vand.u32 4294901760, %v4061_v32  ;;  %v809_v6 = vand.u32 4294901760, %v808_v43 }
  0xf4   : > { %v821_v12 = vand.u32 4294901760, %v820_v62  ;;  %v826_v4 = vsub.f32 %v4056_v10, %v825_v41  ;;  %v3379_v44 = vpack.c.bf16 %v813_v61, %v801_v0  ;;  %v832_v16 = vsub.f32 %v4058_v49, %v831_v40  ;;  %v3399_v62 = vld [vmem:[%s2848_s9 + $0x10] sm:$0xff] }
  0xf5   : > { %2027 = vmatpush1.bf16.msra.mxu1 %v2026_v19  ;;  %2219 = vmatpush1.bf16.msra.mxu0 %v3300_v52  ;;  %v838_v19 = vsub.f32 %v4057_v21, %v837_v26  ;;  %v2040_v52 = vpack.c.bf16 %v791_v9, %v779_v53  ;;  %v844_v17 = vsub.f32 %v4059_v15, %v843_v58  ;;  %v3388_v37 = vand.u32 4294901760, %v3373_v31 }
  0xf6   : > { %2029 = vmatprep.subr.bf16.mxu1 %v3312_v13  ;;  %2221 = vmatprep.subr.bf16.mxu0 %v3305_v3  ;;  %v3383_v56 = vpack.c.bf16 %v797_v23, %v785_v8  ;;  %v850_v13 = vsub.f32 %v4060_v24, %v849_v20  ;;  %v862_v3 = vsub.f32 %v4061_v32, %v861_v39  ;;  %v827_v23 = vand.u32 4294901760, %v826_v4 }
  0xf7   : > { %v3392_v43 = vpack.c.bf16 %v815_v54, %v803_v33  ;;  %v3394_v0 = vpack.c.bf16 %v819_v34, %v807_v7  ;;  %v3396_v61 = vpack.c.bf16 %v837_v26, %v825_v41  ;;  %4063 = vst [vmem:[#allocation71_spill] sm:$0xff] %v3399_v62  ;;  %v3403_v8 = vpack.c.bf16 %v821_v12, %v809_v6  ;;  %v4065_v41 = vld [vmem:[#allocation103_spill] sm:$0xff] }
  0xf8   : > { %v839_v53 = vand.u32 4294901760, %v838_v19  ;;  %v833_v9 = vand.u32 4294901760, %v832_v16  ;;  %v3909_v33 = vand.u32 4294901760, %v3098_v51  ;;  %v3409_v54 = vsub.f32 %v3373_v31, %v3388_v37  ;;  %v4098_v31 = vld [vmem:[#allocation82_spill] sm:$0xff] }
  0xf9   : > { %2031 = vmatpush1.bf16.msra.mxu1 %v3321_v27  ;;  %2223 = vmatpush1.bf16.msra.mxu0 %v3314_v50  ;;  %v3910_v27 = vand.u32 4294901760, %v3096_v11  ;;  %v845_v50 = vand.u32 4294901760, %v844_v17  ;;  %v851_v7 = vand.u32 4294901760, %v850_v13  ;;  %v863_v34 = vand.u32 4294901760, %v862_v3 }
  0xfa   : > { %2033 = vmatprep.subr.bf16.mxu1 %v3330_v36  ;;  %2225 = vmatprep.subr.bf16.mxu0 %v3318_v60  ;;  %4064 = vst [vmem:[#allocation76_spill] sm:$0xff] %v3409_v54  ;;  %v3908_v36 = vand.u32 4294901760, %v4065_v41  ;;  %v3413_v60 = vand.u32 4294901760, %v3399_v62  ;;  %v3417_v26 = vpack.c.bf16 %v843_v58, %v831_v40  ;;  %v496_v6 = vand.u32 4294901760, %v3409_v54 }
  0xfb   : > { %v3907_v12 = vand.u32 4294901760, %v3120_v48  ;;  %v3906_v4 = vand.u32 4294901760, %v3122_v25  ;;  %v2048_v19 = vpack.c.bf16 %v839_v53, %v827_v23  ;;  %v3424_v16 = vpack.c.bf16 %v861_v39, %v849_v20  ;;  %v4080_v53 = vld [vmem:[#allocation45_spill] sm:$0xff] }
  0xfc   : > { %v3435_v40 = vsub.f32 %v3096_v11, %v3910_v27  ;;  %v497_v58 = vsub.f32 %v3409_v54, %v496_v6  ;;  %1268 = vmatprep.mubr.f32.mxu0 %v496_v6  ;;  %v868_v20 = vsub.f32 %v3098_v51, %v3909_v33  ;;  %v3447_v39 = vsub.f32 %v4065_v41, %v3908_v36  ;;  %v4073_v36 = vld [vmem:[#allocation98_spill] sm:$0xff]  ;;  %v4085_v27 = vld [vmem:[#allocation53_spill] sm:$0xff]  ;;  %v4094_v33 = vld [vmem:[#allocation68_spill] sm:$0xff] }
  0xfd   : > { %2035 = vmatpush1.bf16.msra.mxu1 %v3338_v55  ;;  %2227 = vmatpush1.bf16.msra.mxu0 %v3332_v30  ;;  %v3428_v55 = vsub.f32 %v3399_v62, %v3413_v60  ;;  %v3430_v30 = vpack.c.bf16 %v845_v50, %v833_v9  ;;  %v886_v3 = vsub.f32 %v3120_v48, %v3907_v12  ;;  %v4068_v50 = vld [vmem:[#allocation30_spill] sm:$0xff]  ;;  %v4096_v62 = vld [vmem:[#allocation79_spill] sm:$0xff]  ;;  %v4106_v22 = vand.u32 4294901760, %v4065_v41 }
  0xfe   : > { %2037 = vmatprep.subr.bf16.mxu1 %v3347_v35  ;;  %2229 = vmatprep.subr.bf16.mxu0 %v3340_v18  ;;  %v3917_v35 = vand.u32 4294901760, %v3129_v38  ;;  %v3439_v18 = vpack.c.bf16 %v863_v34, %v851_v7  ;;  %v498_v13 = vand.u32 4294901760, %v497_v58  ;;  %v3458_v23 = vsub.f32 %v3122_v25, %v3906_v4  ;;  %v4070_v58 = vld [vmem:[#allocation32_spill] sm:$0xff]  ;;  %v4075_v9 = vld [vmem:[#allocation38_spill] sm:$0xff]  ;;  %v4099_v7 = vld [vmem:[#allocation83_spill] sm:$0xff] }
  0xff   : > { %4066 = vst [vmem:[#allocation91_spill] sm:$0xff] %v3428_v55  ;;  %v502_v17 = vand.u32 4294901760, %v3428_v55  ;;  %v869_v54 = vand.u32 4294901760, %v868_v20  ;;  %v4095_v20 = vld [vmem:[#allocation77_spill] sm:$0xff]  ;;  %v4101_v4 = vld [vmem:[#allocation86_spill] sm:$0xff] }
 0x100   : > { %499 = vmatprep.mubr.f32.mxu1 %v498_v13  ;;  %v892_v34 = vsub.f32 %v3129_v38, %v3917_v35  ;;  %v4086_v13 = vld [vmem:[#allocation54_spill] sm:$0xff]  ;;  %v2108_v6 = vpack.c.bf16 %v4101_v4, %v4100_v57  ;;  %v887_v35 = vand.u32 4294901760, %v886_v3  ;;  %v4105_v3 = vand.u32 4294901760, %v3098_v51  ;;  %v4186_v57 = vld [vmem:[#allocation93_spill] sm:$0xff] }
 0x101   : > { %2039 = vmatpush1.bf16.msra.mxu1 %v3363_v28  ;;  %2231 = vmatpush1.bf16.msra.mxu0 %v3343_v42  ;;  %v503_v28 = vsub.f32 %v3428_v55, %v502_v17  ;;  %v4067_v42 = vld [vmem:[#allocation29_spill] sm:$0xff]  ;;  %v4089_v55 = vld [vmem:[#allocation59_spill] sm:$0xff]  ;;  %v4187_v4 = vpack.c.bf16 %v4061_v32, %v4060_v24  ;;  %v4194_v32 = vld [vmem:[#allocation106_spill] sm:$0xff] }
 0x102   : > { %2041 = vmatprep.subr.bf16.mxu1 %v2040_v52  ;;  %2233 = vmatprep.subr.bf16.mxu0 %v3354_v1  ;;  %v4081_v1 = vld [vmem:[#allocation47_spill] sm:$0xff]  ;;  %v4195_v24 = vld [vmem:[#allocation104_spill] sm:$0xff] }
 0x103   : > { %1272 = vmatmul.mubr.f32.gmra.mrb[2].mxu0 %v502_v17  ;;  %v504_v12 = vand.u32 4294901760, %v503_v28  ;;  %v857_v17 = vand.u32 4294901760, %v3435_v40  ;;  %v4093_v52 = vld [vmem:[#allocation67_spill] sm:$0xff]  ;;  %v4097_v28 = vld [vmem:[#allocation80_spill] sm:$0xff]  ;;  %v893_v40 = vand.u32 4294901760, %v892_v34 }
 0x104   : > { %1535 = vmatprep.mubr.f32.mxu0 %v4073_v36 }
 0x105   : > { %2043 = vmatpush1.bf16.msra.mxu1 %v3383_v56  ;;  %2235 = vmatpush1.bf16.msra.mxu0 %v3369_v2  ;;  %v4087_v56 = vld [vmem:[#allocation56_spill] sm:$0xff]  ;;  %v4088_v2 = vld [vmem:[#allocation58_spill] sm:$0xff] }
 0x106   : > { %2045 = vmatprep.subr.bf16.mxu1 %v3392_v43  ;;  %2237 = vmatprep.subr.bf16.mxu0 %v3379_v44  ;;  %v875_v43 = vand.u32 4294901760, %v3447_v39  ;;  %v4102_v44 = vld [vmem:[#allocation88_spill] sm:$0xff] }
 0x107   : > { %505 = vmatmul.mubr.f32.gmra.mrb[2].mxu1 %v504_v12 }
 0x108   : > { %896 = vmatprep.mubr.f32.mxu1 %v4073_v36  ;;  %v2056_v39 = vpack.c.bf16 %v887_v35, %v875_v43  ;;  %v4113_v35 = vld [vmem:[#allocation23_spill] sm:$0xff] }
 0x109   : > { %2047 = vmatpush1.bf16.msra.mxu1 %v3403_v8  ;;  %2239 = vmatpush1.bf16.msra.mxu0 %v3394_v0  ;;  %v881_v8 = vand.u32 4294901760, %v3458_v23  ;;  %v4110_v23 = vld [vmem:[#allocation19_spill] sm:$0xff] }
 0x10a   : > { %2049 = vmatprep.subr.bf16.mxu1 %v2048_v19  ;;  %2241 = vmatprep.subr.bf16.mxu0 %v3396_v61  ;;  %v2054_v19 = vpack.c.bf16 %v869_v54, %v857_v17  ;;  %v4104_v61 = vand.u32 4294901760, %v3096_v11  ;;  %v4109_v17 = vand.u32 4294901760, %v3129_v38 }
 0x10b   : > { %v2058_v54 = vpack.c.bf16 %v893_v40, %v881_v8  ;;  %v4116_v40 = vld [vmem:[#allocation26_spill] sm:$0xff] }
 0x10c   : > { %v2246_v12 = vpack.c.bf16 %v4105_v3, %v4104_v61  ;;  %v4120_v3 = vpack.c.bf16 %v2896_v46, %v2894_v45  ;;  %v4127_v45 = vld [vmem:[#allocation31_spill] sm:$0xff] }
 0x10d   : > { %2051 = vmatpush1.bf16.msra.mxu1 %v3430_v30  ;;  %2243 = vmatpush1.bf16.msra.mxu0 %v3417_v26  ;;  %v4107_v30 = vand.u32 4294901760, %v3120_v48  ;;  %v4108_v26 = vand.u32 4294901760, %v3122_v25  ;;  %v4128_v46 = vpack.c.bf16 %v4070_v58, %v4127_v45  ;;  %v4140_v58 = vld [vmem:[#allocation39_spill] sm:$0xff]  ;;  %v4154_v45 = vpack.c.bf16 %v4087_v56, %v4086_v13  ;;  %v4165_v13 = vld [vmem:[#allocation64_spill] sm:$0xff] }
 0x10e   : > { %2053 = vmatprep.subr.bf16.mxu1 %v3439_v18  ;;  %2245 = vmatprep.subr.bf16.mxu0 %v3424_v16  ;;  %v4111_v18 = vld [vmem:[#allocation20_spill] sm:$0xff]  ;;  %v4112_v16 = vld [vmem:[#allocation22_spill] sm:$0xff]  ;;  %v4166_v56 = vpack.c.bf16 %v4094_v33, %v4093_v52  ;;  %v4175_v33 = vld [vmem:[#allocation75_spill] sm:$0xff]  ;;  %v4176_v52 = vpack.c.bf16 %v4097_v28, %v4096_v62  ;;  %v4183_v28 = vpack.c.bf16 %v4057_v21, %v4056_v10 }
 0x10f   : > { %v2248_v0 = vpack.c.bf16 %v4107_v30, %v4106_v22  ;;  %v2250_v61 = vpack.c.bf16 %v4109_v17, %v4108_v26  ;;  %v2060_v34 = vpack.c.bf16 %v4111_v18, %v4110_v23  ;;  %v2062_v43 = vpack.c.bf16 %v4113_v35, %v4112_v16  ;;  %v4114_v22 = vld [vmem:[#allocation16_spill] sm:$0xff]  ;;  %v4121_v30 = vld [vmem:[#allocation21_spill] sm:$0xff]  ;;  %v4124_v17 = vld [vmem:[#allocation102_spill] sm:$0xff] }
 0x110   : > { %v4123_v26 = vld [vmem:[#allocation25_spill] sm:$0xff]  ;;  %v4126_v23 = vld [vmem:[#allocation27_spill] sm:$0xff]  ;;  %v4129_v18 = vld [vmem:[#allocation28_spill] sm:$0xff]  ;;  %v4191_v21 = vpack.c.bf16 %v3120_v48, %v4065_v41 }
 0x111   : > { %2055 = vmatpush1.bf16.msra.mxu1 %v2054_v19  ;;  %2247 = vmatpush1.bf16.msra.mxu0 %v2246_v12  ;;  %v4115_v12 = vld [vmem:[#allocation24_spill] sm:$0xff]  ;;  %v4133_v16 = vld [vmem:[#allocation33_spill] sm:$0xff]  ;;  %v4182_v62 = vld [vmem:[#allocation87_spill] sm:$0xff] }
 0x112   : > { %2057 = vmatprep.subr.bf16.mxu1 %v2056_v39  ;;  %2249 = vmatprep.subr.bf16.mxu0 %v2248_v0  ;;  %v2064_v8 = vpack.c.bf16 %v4116_v40, %v4115_v12  ;;  %v4117_v19 = vld [vmem:[#allocation100_spill] sm:$0xff]  ;;  %v4118_v0 = vld [vmem:[#allocation17_spill] sm:$0xff]  ;;  %v4119_v39 = vld [vmem:[#allocation18_spill] sm:$0xff] }
 0x113   : > { %v4141_v12 = vld [vmem:[#allocation44_spill] sm:$0xff]  ;;  %v4142_v40 = vld [vmem:[#allocation42_spill] sm:$0xff]  ;;  %v4190_v10 = vld [vmem:[#allocation101_spill] sm:$0xff] }
 0x114   : > { %v1696_v41 = vld [vmem:[%s2856_s10] sm:$0xff] }
 0x115   : > { %2059 = vmatpush1.bf16.msra.mxu1 %v2058_v54  ;;  %2251 = vmatpush1.bf16.msra.mxu0 %v2250_v61  ;;  %v4122_v54 = vpack.c.bf16 %v4067_v42, %v2898_v47  ;;  %v4125_v61 = vpack.c.bf16 %v4068_v50, %v2910_v59  ;;  %v4130_v47 = vld [vmem:[#allocation35_spill] sm:$0xff]  ;;  %v4131_v42 = vld [vmem:[#allocation34_spill] sm:$0xff]  ;;  %v4136_v59 = vld [vmem:[#allocation36_spill] sm:$0xff] }
 0x116   : > { %2061 = vmatprep.subr.bf16.mxu1 %v2060_v34  ;;  %2253 = vmatprep.subr.bf16.mxu0 %v4114_v22  ;;  %v4132_v34 = vpack.c.bf16 %v4130_v47, %v4131_v42  ;;  %v4137_v50 = vld [vmem:[#allocation41_spill] sm:$0xff] }
 0x117   : > { %v4159_v47 = vld [vmem:[#allocation61_spill] sm:$0xff] }
 0x118   : > { %898 = vmatmul.mubr.f32.vlgmr.msra.gmra.mrb[0].mxu1 %v4117_v19  ;;  %1537 = vmatmul.mubr.f32.vlgmr.msra.gmra.mrb[0].mxu0 %v4117_v19 }
 0x119   : > { %2063 = vmatpush1.bf16.msra.mxu1 %v2062_v43  ;;  %2255 = vmatpush1.bf16.msra.mxu0 %v4118_v0  ;;  %v4138_v43 = vld [vmem:[#allocation40_spill] sm:$0xff]  ;;  %v4144_v0 = vld [vmem:[#allocation43_spill] sm:$0xff] }
 0x11a   : > { %2065 = vmatprep.subr.bf16.mxu1 %v2064_v8  ;;  %2257 = vmatprep.subr.bf16.mxu0 %v4119_v39  ;;  %v4139_v22 = vpack.c.bf16 %v4137_v50, %v4138_v43  ;;  %v4143_v8 = vpack.c.bf16 %v4141_v12, %v4142_v40  ;;  %v4145_v39 = vpack.c.bf16 %v4081_v1, %v4080_v53  ;;  %v4155_v53 = vld [vmem:[#allocation55_spill] sm:$0xff]  ;;  %v4171_v50 = vld [vmem:[#allocation73_spill] sm:$0xff] }
 0x11b   : > { %904 = vmatprep.mubr.f32.mxu1 %v3388_v37  ;;  %1543 = vmatprep.mubr.f32.mxu0 %v3388_v37  ;;  %v4156_v1 = vpack.c.bf16 %v4089_v55, %v4088_v2  ;;  %v4167_v55 = vld [vmem:[#allocation66_spill] sm:$0xff]  ;;  %v4168_v2 = vpack.c.bf16 %v4047_v14, %v4046_v29  ;;  %v4178_v29 = vpack.c.bf16 %v4099_v7, %v4098_v31  ;;  %v4179_v12 = vld [vmem:[#allocation81_spill] sm:$0xff] }
 0x11c   : > { %906 = vmatmul.mubr.f32.gmra.mrb[2].mxu1 %v3413_v60  ;;  %1545 = vmatmul.mubr.f32.gmra.mrb[2].mxu0 %v3413_v60  ;;  %v4177_v14 = vld [vmem:[#allocation78_spill] sm:$0xff]  ;;  %v4185_v7 = vpack.c.bf16 %v4059_v15, %v4058_v49  ;;  %v4192_v49 = vld [vmem:[#allocation105_spill] sm:$0xff]  ;;  %v4193_v15 = vpack.c.bf16 %v3129_v38, %v3122_v25  ;;  %v1705_v38 = vstv %s1704_s21 }
 0x11d   : > { %2067 = vmatpush1.bf16.msra.mxu1 %v4120_v3  ;;  %2259 = vmatpush1.bf16.msra.mxu0 %v4121_v30  ;;  %v4147_v3 = vld [vmem:[#allocation50_spill] sm:$0xff]  ;;  %v4148_v30 = vld [vmem:[#allocation49_spill] sm:$0xff] }
 0x11e   : > { %2069 = vmatprep.subr.bf16.mxu1 %v4122_v54  ;;  %2261 = vmatprep.subr.bf16.mxu0 %v4123_v26  ;;  %v4149_v54 = vpack.c.bf16 %v4147_v3, %v4148_v30  ;;  %v4150_v26 = vld [vmem:[#allocation48_spill] sm:$0xff]  ;;  %v4184_v31 = vld [vmem:[#allocation90_spill] sm:$0xff]  ;;  %v1719_v30 = vstv %s3692_s25 }
 0x11f   : > { %1106 = vmatprep.mubr.f32.mxu1 %v4124_v17  ;;  %1680 = vmatprep.mubr.f32.mxu0 %v4073_v36  ;;  %v4134_v36 = vld [vmem:[#allocation37_spill] sm:$0xff]  ;;  %v4151_v17 = vld [vmem:[#allocation52_spill] sm:$0xff] }
 0x120   : > { %v4135_v35 = vpack.c.bf16 %v4075_v9, %v4134_v36  ;;  %v4146_v9 = vld [vmem:[#allocation46_spill] sm:$0xff] }
 0x121   : > { %2071 = vmatpush1.bf16.msra.mxu1 %v4125_v61  ;;  %2263 = vmatpush1.bf16.msra.mxu0 %v4126_v23  ;;  %v4152_v61 = vpack.c.bf16 %v4085_v27, %v4151_v17  ;;  %v4153_v23 = vld [vmem:[#allocation51_spill] sm:$0xff]  ;;  %v4161_v27 = vld [vmem:[#allocation60_spill] sm:$0xff] }
 0x122   : > { %2073 = vmatprep.subr.bf16.mxu1 %v4128_v46  ;;  %2265 = vmatprep.subr.bf16.mxu0 %v4129_v18  ;;  %v4157_v46 = vld [vmem:[#allocation57_spill] sm:$0xff]  ;;  %v4158_v18 = vld [vmem:[#allocation62_spill] sm:$0xff] }
 0x123   : > { %v4160_v42 = vpack.c.bf16 %v4158_v18, %v4159_v47 }
 0x125   : > { %2075 = vmatpush1.bf16.msra.mxu1 %v4132_v34  ;;  %2267 = vmatpush1.bf16.msra.mxu0 %v4133_v16  ;;  %v4162_v34 = vld [vmem:[#allocation65_spill] sm:$0xff]  ;;  %v4163_v16 = vld [vmem:[#allocation63_spill] sm:$0xff] }
 0x126   : > { %2077 = vmatprep.subr.bf16.mxu1 %v4135_v35  ;;  %2269 = vmatprep.subr.bf16.mxu0 %v4136_v59  ;;  %v4164_v36 = vpack.c.bf16 %v4162_v34, %v4163_v16  ;;  %v4169_v35 = vld [vmem:[#allocation69_spill] sm:$0xff]  ;;  %v4170_v59 = vld [vmem:[#allocation74_spill] sm:$0xff]  ;;  %v1699_v34 = vld [vmem:[%s2856_s10 + $0x18] sm:$0xff] }
 0x127   : > { %v4172_v43 = vpack.c.bf16 %v4170_v59, %v4171_v50 }
 0x129   : > { %2079 = vmatpush1.bf16.msra.mxu1 %v4139_v22  ;;  %2271 = vmatpush1.bf16.msra.mxu0 %v4140_v58  ;;  %v4173_v22 = vld [vmem:[#allocation72_spill] sm:$0xff]  ;;  %v4174_v58 = vpack.c.bf16 %v4095_v20, %v4049_v63  ;;  %v4181_v20 = vpack.c.bf16 %v4103_v5, %v4102_v44 }
 0x12a   : > { %2081 = vmatprep.subr.bf16.mxu1 %v4143_v8  ;;  %2273 = vmatprep.subr.bf16.mxu0 %v4144_v0  ;;  %v4180_v63 = vld [vmem:[#allocation84_spill] sm:$0xff]  ;;  %v1697_v8 = vld [vmem:[%s2856_s10 + $0x8] sm:$0xff]  ;;  %v1711_v0 = vstv %s3690_s28 }
 0x12b   : > { %v4188_v5 = vld [vmem:[#allocation96_spill] sm:$0xff] }
 0x12c   : > { %v2416_v44 = vld [vmem:[%s2848_s9] sm:$0xff] }
 0x12d   : > { %2083 = vmatpush1.bf16.msra.mxu1 %v4145_v39  ;;  %2275 = vmatpush1.bf16.msra.mxu0 %v4146_v9  ;;  %v2417_v9 = vld [vmem:[%s2848_s9 + $0x8] sm:$0xff]  ;;  %v1720_v47 = vmul.f32 %v2416_v44, %v1719_v30  ;;  %s2525_s9 = scalar_lea.vmem %s2524_s24, 1024 }
 0x12e   : > { %2085 = vmatprep.subr.bf16.mxu1 %v4149_v54  ;;  %2277 = vmatprep.subr.bf16.mxu0 %v4150_v26  ;;  %v1707_v3 = vmul.f32 %v2417_v9, %v1705_v38  ;;  %p2527_p0 = scmp.lt.s32.totalorder %s2525_s9, %s2519_s0 }
 0x130   : > { %p2528_p3 = por %p2527_p0, %p2526_p12 }
 0x131   : > { %2087 = vmatpush1.bf16.msra.mxu1 %v4152_v61  ;;  %2279 = vmatpush1.bf16.msra.mxu0 %v4153_v23  ;;  %v1698_v23 = vld [vmem:[%s2856_s10 + $0x10] sm:$0xff] }
 0x132   : > { %2089 = vmatprep.subr.bf16.mxu1 %v4154_v45  ;;  %2281 = vmatprep.subr.bf16.mxu0 %v4155_v53  ;;  %v1725_v45 = vstv %s3694_s14  ;;  %p2529_p7 = pnand %p2528_p3, %p2522_p4 }
 0x135   : > { %2091 = vmatpush1.bf16.msra.mxu1 %v4156_v1  ;;  %2283 = vmatpush1.bf16.msra.mxu0 %v4157_v46  ;;  %v4198_v1 = vld [vmem:[#allocation71_spill] sm:$0xff] }
 0x136   : > { %2093 = vmatprep.subr.bf16.mxu1 %v4160_v42  ;;  %2285 = vmatprep.subr.bf16.mxu0 %v4161_v27  ;;  %v1712_v46 = vmul.f32 %v1711_v0, %v4198_v1 }
 0x139   : > { %2095 = vmatpush1.bf16.msra.mxu1 %v4164_v36  ;;  %2287 = vmatpush1.bf16.msra.mxu0 %v4165_v13  ;;  %v4199_v36 = vld [vmem:[#allocation70_spill] sm:$0xff] }
 0x13a   : > { %2097 = vmatprep.subr.bf16.mxu1 %v4166_v56  ;;  %2289 = vmatprep.subr.bf16.mxu0 %v4167_v55  ;;  %v1713_v13 = vmul.f32 %v1711_v0, %v4199_v36  ;;  %v1721_v55 = vmul.f32 %v2417_v9, %v1719_v30  ;;  %v1727_v50 = vmul.f32 %v1725_v45, %v4199_v36 }
 0x13d   : > { %2099 = vmatpush1.bf16.msra.mxu1 %v4168_v2  ;;  %2291 = vmatpush1.bf16.msra.mxu0 %v4169_v35  ;;  %v1726_v35 = vmul.f32 %v1725_v45, %v4198_v1 }
 0x13e   : > { %2101 = vmatprep.subr.bf16.mxu1 %v4172_v43  ;;  %2293 = vmatprep.subr.bf16.mxu0 %v4173_v22 }
 0x141   : > { %2103 = vmatpush1.bf16.msra.mxu1 %v4174_v58  ;;  %2295 = vmatpush1.bf16.msra.mxu0 %v4175_v33 }
 0x142   : > { %2105 = vmatprep.subr.bf16.mxu1 %v4176_v52  ;;  %2297 = vmatprep.subr.bf16.mxu0 %v4177_v14 }
 0x145   : > { %2107 = vmatpush1.bf16.msra.mxu1 %v4178_v29  ;;  %2299 = vmatpush1.bf16.msra.mxu0 %v4179_v12 }
 0x146   : > { %2109 = vmatprep.subr.bf16.mxu1 %v2108_v6  ;;  %2301 = vmatprep.subr.bf16.mxu0 %v4180_v63  ;;  %v4189_v6 = vpack.c.bf16 %v3098_v51, %v3096_v11  ;;  %v4196_v11 = vld [vmem:[#allocation76_spill] sm:$0xff]  ;;  %v4197_v51 = vld [vmem:[#allocation91_spill] sm:$0xff] }
 0x149   : > { %2111 = vmatpush1.bf16.msra.mxu1 %v4181_v20  ;;  %2303 = vmatpush1.bf16.msra.mxu0 %v4182_v62 }
 0x14a   : > { %2113 = vmatprep.subr.bf16.mxu1 %v4183_v28  ;;  %2305 = vmatprep.subr.bf16.mxu0 %v4184_v31 }
 0x14d   : > { %2115 = vmatpush1.bf16.msra.mxu1 %v4185_v7  ;;  %2307 = vmatpush1.bf16.msra.mxu0 %v4186_v57 }
 0x14e   : > { %2117 = vmatprep.subr.bf16.mxu1 %v4187_v4  ;;  %2309 = vmatprep.subr.bf16.mxu0 %v4188_v5 }
 0x151   : > { %2119 = vmatpush1.bf16.msra.mxu1 %v4189_v6  ;;  %2311 = vmatpush1.bf16.msra.mxu0 %v4190_v10 }
 0x152   : > { %2121 = vmatprep.subr.bf16.mxu1 %v4191_v21  ;;  %2313 = vmatprep.subr.bf16.mxu0 %v4192_v49 }
 0x155   : > { %2123 = vmatpush1.bf16.msra.mxu1 %v4193_v15  ;;  %2315 = vmatpush1.bf16.msra.mxu0 %v4194_v32 }
 0x158   : > { %1109 = vmatmul.mubr.f32.vlgmr.msra.gmra.mrb[0].mxu1 %v4195_v24  ;;  %1682 = vmatmul.mubr.f32.vlgmr.msra.gmra.mrb[0].mxu0 %v4117_v19  ;;  %v1706_v19 = vmul.f32 %v2416_v44, %v1705_v38 }
 0x159   : > { %1116 = vmatprep.mubr.f32.mxu1 %v4196_v11  ;;  %1688 = vmatprep.mubr.f32.mxu0 %v3388_v37 }
 0x15c   : > { %1119 = vmatmul.mubr.f32.gmra.mrb[2].mxu1 %v4197_v51  ;;  %1690 = vmatmul.mubr.f32.gmra.mrb[2].mxu0 %v3413_v60 }
 0x22b   : > { %v1110_v25 = vpop.f32.mrb[0].mxu1  ;;  %v1683_v48 = vpop.f32.mrb[0].mxu0 }
 0x22c   : > { %v2316_v37 = vadd.f32 %v1683_v48, %v1110_v25  ;;  %v1112_v60 = vpop.f32.mrb[1].mxu1  ;;  %v1685_v40 = vpop.f32.mrb[1].mxu0 }
 0x22d   : > { %v2317_v39 = vadd.f32 %v1685_v40, %v1112_v60 }
 0x22e   : > { %v1700_v54 = vadd.f32 %v2316_v37, %v1696_v41 }
 0x22f   : > { %v1701_v26 = vadd.f32 %v2317_v39, %v1697_v8  ;;  %v1120_v17 = vpop.f32.mrb[2].mxu1  ;;  %v1691_v61 = vpop.f32.mrb[2].mxu0 }
 0x230   : > { %v1708_v53 = vadd.f32 %v1706_v19, %v1700_v54  ;;  %v2318_v18 = vadd.f32 %v1691_v61, %v1120_v17  ;;  %v1122_v42 = vpop.f32.mrb[3].mxu1  ;;  %v1693_v27 = vpop.f32.mrb[3].mxu0 }
 0x231   : > { %v1709_v16 = vadd.f32 %v1707_v3, %v1701_v26  ;;  %v2319_v56 = vadd.f32 %v1693_v27, %v1122_v42 }
 0x232   : > { %v1702_v2 = vadd.f32 %v2318_v18, %v1698_v23  ;;  %v1714_v43 = vadd.f32 %v1712_v46, %v1708_v53 }
 0x233   : > { %v1703_v59 = vadd.f32 %v2319_v56, %v1699_v34  ;;  %v1715_v58 = vadd.f32 %v1713_v13, %v1709_v16 }
 0x234   : > { %v1722_v22 = vadd.f32 %v1720_v47, %v1702_v2  ;;  %v1716_v29 = vmul.f32 %v2416_v44, %v1714_v43 }
 0x235   : > { %v1723_v33 = vadd.f32 %v1721_v55, %v1703_v59  ;;  %v1717_v63 = vmul.f32 %v2417_v9, %v1715_v58 }
 0x236   : > { %v1728_v52 = vadd.f32 %v1726_v35, %v1722_v22 }
 0x237   : > { %v1729_v14 = vadd.f32 %v1727_v50, %v1723_v33 }
 0x238   : > { %v1730_v12 = vmul.f32 %v1728_v52, %v4198_v1 }
 0x239   : > { %v1731_v20 = vmul.f32 %v1729_v14, %v4199_v36 }
 0x23a   : > { %v1732_v62 = vadd.f32 %v1730_v12, %v1716_v29 }
 0x23b   : > { %v1733_v28 = vadd.f32 %v1731_v20, %v1717_v63 }
 0x23c   : > { %v1734_v31 = vmul.f32 %v2416_v44, %v1732_v62  ;;  %v1744_v7 = vmul.f32 %v1732_v62, %v4198_v1 }
 0x23d   : > { %v1735_v57 = vmul.f32 %v2417_v9, %v1733_v28  ;;  %v1745_v4 = vmul.f32 %v1733_v28, %v4199_v36 }
 0x23e   : > { %v1736_v5 = vsub.f32 %v1714_v43, %v1734_v31  ;;  %v1746_v6 = vsub.f32 %v1728_v52, %v1744_v7 }
 0x23f   : > { %v1737_v10 = vsub.f32 %v1715_v58, %v1735_v57  ;;  %v1747_v21 = vsub.f32 %v1729_v14, %v1745_v4 }
 0x240   : > { %v1738_v49 = vmul.f32 0.01, %v1736_v5  ;;  %v1748_v15 = vmul.f32 0.01, %v1746_v6 }
 0x241   : > { %v1739_v32 = vmul.f32 0.01, %v1737_v10  ;;  %v1749_v24 = vmul.f32 0.01, %v1747_v21 }
 0x242   : > { %v1740_v11 = vadd.f32 %v2416_v44, %v1738_v49  ;;  %v1750_v51 = vadd.f32 %v1748_v15, %v4198_v1 }
 0x243   : > { %v1741_v38 = vadd.f32 %v2417_v9, %v1739_v32  ;;  %v1751_v25 = vadd.f32 %v1749_v24, %v4199_v36 }
 0x244   : > { %v1742_v48 = vmul.f32 %v1740_v11, %v1740_v11  ;;  %v1752_v41 = vmul.f32 %v1750_v51, %v1750_v51 }
 0x245   : > { %v1743_v37 = vmul.f32 %v1741_v38, %v1741_v38  ;;  %v1753_v19 = vmul.f32 %v1751_v25, %v1751_v25 }
 0x246   : > { %v1754_v60 = vadd.f32 %v1752_v41, %v1742_v48 }
 0x247   : > { %v1755_v40 = vadd.f32 %v1753_v19, %v1743_v37 }
 0x248   : > { %2412 = vrsqrt.f32 %v1754_v60  ;;  %vm1756_vm0 = vcmp.gt.f32.partialorder %v1754_v60, 0.0 }
 0x249   : > { %2414 = vrsqrt.f32 %v1755_v40  ;;  %vm1757_vm1 = vcmp.gt.f32.partialorder %v1755_v40, 0.0 }
 0x252   : > { %v2413_v8 = vpop.eup %2412 }
 0x253   : > { %v2415_v44 = vpop.eup %2414  ;;  %v1760_v0 = vsel %vm1756_vm0, %v2413_v8, 0.0 }
 0x254   : > { %v1762_v39 = vmul.f32 %v1760_v0, %v1740_v11  ;;  %v1766_v9 = vmul.f32 %v1760_v0, %v1750_v51  ;;  %v1761_v3 = vsel %vm1757_vm1, %v2415_v44, 0.0 }
 0x255   : > { %v1763_v30 = vmul.f32 %v1761_v3, %v1741_v38  ;;  %v1767_v54 = vmul.f32 %v1761_v3, %v1751_v25 }
 0x256   : > { %1764 = vst [vmem:[%s281_s12] sm:$0xff] %v1762_v39  ;;  %1922 = vst [vmem:[%s281_s12 + $0x10] sm:$0xff] %v1766_v9 }
 0x257   : > { %1765 = vst [vmem:[%s281_s12 + $0x8] sm:$0xff] %v1763_v30  ;;  %1923 = vst [vmem:[%s281_s12 + $0x18] sm:$0xff] %v1767_v54 }
 0x258   : > { %2532 = shalt.err (!%p2529_p7)
}
 0x259   : > { %s2533_s23 = scalar_lea.hbm %s3720_s30, 512  ;;  %s2537_s21 = scalar_lea.hbm %s3770_s4, 1024 }
 0x25a   : > { %p2534_p1 = scmp.ne.s32.totalorder %s3720_s30, %s2533_s23  ;;  %p2538_p11 = scmp.lt.u32.totalorder %s3720_s30, %s3770_s4 }
 0x25b   : > { %p2539_p2 = scmp.lt.u32.totalorder %s2537_s21, %s2533_s23  ;;  %p2541_p8 = scmp.lt.u32.totalorder %s2533_s23, %s3720_s30 }
 0x25c   : > { %p2535_p13 = pnand %p2534_p1, %p2745_p5 }
 0x25d   : > { %p2540_p6 = por %p2539_p2, %p2538_p11 }
 0x25e   : > { %p2536_p9 = pneg %p2535_p13 }
 0x25f   : > { %p2542_p10 = por %p2541_p8, %p2540_p6 }
 0x261   : > { %p2543_p4 = pnand %p2542_p10, %p2536_p9 }
 0x263   : > { %2546 = shalt.err (!%p2543_p4)
}
 0x264   : > { %s2606_s14 = smov 256   ;;  %s2607_s11 = smov 16  }
 0x265   : > { %2348 = dma.vmem_to_hbm [thread:$0]  (%p2745_p5), %s3722_s20, 512, %s3720_s30, %s1772_s19, %s2606_s14, %s2606_s14, %s2607_s11  }
 0x266 PF: > { %s1800_s12 = sand.u32 1, %s2585_s15   ;;  %p4200_p12 = scmp.ne.s32.totalorder %s3923_s22, 0 }
 0x267   : > { %p4201_p0 = scmp.ge.s32.totalorder %s2597_s18, 2  ;;  %s1801_s5 = scalar_lea.sflag [#allocation4], %s1800_s12 }
 0x269   : > { %p2365_p3 = pnand %p4201_p0, %p4200_p12 }
 0x26b   : > { %2580 = dma.done.wait (!%p2365_p3), %s1801_s5, 512  }
 0x26c   : > { %2582 = vsyncadd (!%p2365_p3), %s1801_s5, 4294966784  ;;  %p21_p7 = scmp.ge.s32.totalorder %s2687_s27, 4   ;;  %s4202_s15 = smov %s2589_s16 }
 0x26d   : > { %s4203_s16 = smov %s2593_s17  ;;  %s4204_s17 = smov %s2741_s26 }
 0x26e   : > { %s4205_s18 = smov %s2687_s27  ;;  %23 = sbr.rel (!%p21_p7) target bundleno = 10 (0xa), region = 104 }
 0x275   :  { %1806 = vsyncpa [#allocation3], 1 }
 0x276   :  { %1808 = vsyncpa [#allocation3 + $0x1], 1 }
 0x277   :  { %1809 = vsyncpa [#allocation8], 1 }
 0x278   :  { %1811 = vsyncpa [#allocation8 + $0x1], 1 }
 0x279   :  { %1812 = vsyncpa [#allocation4], 1 }
 0x27a   :  { %1814 = vsyncpa [#allocation4 + $0x1], 1 }
 0x27b   :  { %1815 = vsyncpa [#allocation5], 1 }
 0x27c   :  { %1817 = vsyncpa [#allocation5 + $0x1], 1 }

</bundles_post_ra>
